<compile_context>
chip_gen: v5e
topology: v5e:2x2
jax: 0.10.0
libtpu: 0.0.40
codegen_flags: <defaults>
</compile_context>

<pallas_src>
import jax
import jax.numpy as jnp
from jax.experimental import pallas as pl
from jax.experimental.pallas import tpu as pltpu


# ----------------------------- Pallas kernel ------------------------------- #
def _make_dgcn_kernel(*, Np, TR, Hp, Lp, Q, T):
    NB = 3          # three directed propagations (A, A_in, A_out)
    NL = 3          # three DGCN blocks

    def kernel(qsrc_ref, qdst_ref,                      # scalar prefetch (SMEM)
               x_ref, adj_ref, w1_ref, w2s_ref, w3s_ref,
               b1_ref, b2_ref, b3_ref, wls_ref, wld_ref, blin_ref,
               out_ref,
               z_ref, r_ref, curb_ref, ps_ref, pd_ref):
        l = pl.program_id(0)        # layer index
        t = pl.program_id(1)        # row tile of the stacked adjacency

        def combine(wstack_ref):
            # lin_{l+1}(relu(cat(x1, x2, x3))) == sum_b relu(x_b) @ W_b
            acc = jnp.zeros((Np, Hp), jnp.float32)
            for b in range(NB):
                rb = r_ref[b * Np:(b + 1) * Np, :].astype(jnp.bfloat16)
                acc = acc + jnp.dot(rb, wstack_ref[b],
                                    preferred_element_type=jnp.float32)
            return acc

        # ------- layer prologue: once per layer, at its first row tile -------
        @pl.when(t == 0)
        def _prologue():
            @pl.when(l == 0)
            def _():
                z = jnp.dot(x_ref[...], w1_ref[...],
                            preferred_element_type=jnp.float32)
                z_ref[...] = z.astype(jnp.bfloat16)
                curb_ref[...] = b1_ref[...]

            @pl.when(l == 1)
            def _():
                z_ref[...] = combine(w2s_ref).astype(jnp.bfloat16)
                curb_ref[...] = b2_ref[...]

            @pl.when(l == 2)
            def _():
                z_ref[...] = combine(w3s_ref).astype(jnp.bfloat16)
                curb_ref[...] = b3_ref[...]

        # ------- propagate one row tile: relu(adj_tile @ z + bias) -----------
        acc = jnp.dot(adj_ref[...], z_ref[...],
                      preferred_element_type=jnp.float32)
        row0 = pl.multiple_of(t * TR, TR)
        r_ref[pl.ds(row0, TR), :] = jnp.maximum(acc + curb_ref[...], 0.0)

        # ------- epilogue: final linear, query gather, softmax ---------------
        @pl.when(jnp.logical_and(l == NL - 1, t == T - 1))
        def _epilogue():
            ps = jnp.zeros((Np, Lp), jnp.float32)
            pd = jnp.zeros((Np, Lp), jnp.float32)
            for b in range(NB):
                rb = r_ref[b * Np:(b + 1) * Np, :].astype(jnp.bfloat16)
                ps = ps + jnp.dot(rb, wls_ref[b],
                                  preferred_element_type=jnp.float32)
                pd = pd + jnp.dot(rb, wld_ref[b],
                                  preferred_element_type=jnp.float32)
            ps_ref[...] = ps          # per-node projection, src half of linear
            pd_ref[...] = pd          # per-node projection, dst half of linear

            # TODO(synk): dropout skipped (dropout=0.0 / eval => identity).
            for q in range(Q):        # Q is small & static -> unrolled gather
                s = qsrc_ref[q]
                d = qdst_ref[q]
                out_ref[q:q + 1, :] = (ps_ref[pl.ds(s, 1), :]
                                       + pd_ref[pl.ds(d, 1), :])

            logits = out_ref[...] + blin_ref[...]     # padded lanes get -1e30
            m = jnp.max(logits, axis=-1, keepdims=True)
            e = jnp.exp(logits - m)
            out_ref[...] = e * pl.reciprocal(
                jnp.sum(e, axis=-1, keepdims=True), approx=True)

    return kernel


# ------------------------------- Wrapper ------------------------------------ #
def _round_up(a, b):
    return ((a + b - 1) // b) * b


def _pad2(a, rows, cols, fill=0.0):
    out = jnp.full((rows, cols), fill, jnp.float32)
    return out.at[:a.shape[0], :a.shape[1]].set(a.astype(jnp.float32))


def dgcn_link_prediction(x, A, Ain, Aout, params, query_edges,
                         *, max_rows_per_tile=256):
    N, F = x.shape
    H = params["w1"].shape[1]
    L = params["wlin"].shape[1]
    Q = query_edges.shape[0]

    # lane-dense padding and row-tile geometry
    Hp = _round_up(H, 128)
    Lp = _round_up(L, 128)
    tiles_per_branch = max(1, -(-N // max_rows_per_tile))
    TR = _round_up(-(-N // tiles_per_branch), 16)
    Np = tiles_per_branch * TR
    T = 3 * tiles_per_branch

    bf16, f32 = jnp.bfloat16, jnp.float32

    # node features and stacked normalized adjacency [A; A_in; A_out]
    x_p = _pad2(x, Np, F).astype(bf16)
    adj = jnp.concatenate(
        [_pad2(A, Np, Np), _pad2(Ain, Np, Np), _pad2(Aout, Np, Np)],
        axis=0).astype(bf16)                                  # [3*Np, Np]

    # weights (already [in, out] layout) -> padded / branch-split / stacked
    w1_p = _pad2(params["w1"], F, Hp).astype(bf16)
    w2s = jnp.stack([_pad2(params["w2"][b * H:(b + 1) * H], Hp, Hp)
                     for b in range(3)]).astype(bf16)         # [3, Hp, Hp]
    w3s = jnp.stack([_pad2(params["w3"][b * H:(b + 1) * H], Hp, Hp)
                     for b in range(3)]).astype(bf16)         # [3, Hp, Hp]
    b1_p = _pad2(params["b1"], 1, Hp)
    b2_p = _pad2(params["b2"], 1, Hp)
    b3_p = _pad2(params["b3"], 1, Hp)
    wlin = params["wlin"]                                     # [6H, L]
    wls = jnp.stack([_pad2(wlin[b * H:(b + 1) * H], Hp, Lp)
                     for b in range(3)]).astype(bf16)         # src half
    wld = jnp.stack([_pad2(wlin[3 * H + b * H:3 * H + (b + 1) * H], Hp, Lp)
                     for b in range(3)]).astype(bf16)         # dst half
    blin_p = jnp.full((1, Lp), -1e30, f32).at[:, :L].set(
        params["blin"].astype(f32))

    qsrc = query_edges[:, 0].astype(jnp.int32)
    qdst = query_edges[:, 1].astype(jnp.int32)

    kernel = _make_dgcn_kernel(Np=Np, TR=TR, Hp=Hp, Lp=Lp, Q=Q, T=T)

    grid_spec = pltpu.PrefetchScalarGridSpec(
        num_scalar_prefetch=2,
        grid=(3, T),
        in_specs=[
            pl.BlockSpec((Np, F), lambda l, t, *_: (0, 0)),          # x
            pl.BlockSpec((TR, Np), lambda l, t, *_: (t, 0)),         # adj tiles
            pl.BlockSpec((F, Hp), lambda l, t, *_: (0, 0)),          # w1
            pl.BlockSpec((3, Hp, Hp), lambda l, t, *_: (0, 0, 0)),   # w2 split
            pl.BlockSpec((3, Hp, Hp), lambda l, t, *_: (0, 0, 0)),   # w3 split
            pl.BlockSpec((1, Hp), lambda l, t, *_: (0, 0)),          # bias1
            pl.BlockSpec((1, Hp), lambda l, t, *_: (0, 0)),          # bias2
            pl.BlockSpec((1, Hp), lambda l, t, *_: (0, 0)),          # bias3
            pl.BlockSpec((3, Hp, Lp), lambda l, t, *_: (0, 0, 0)),   # wlin src
            pl.BlockSpec((3, Hp, Lp), lambda l, t, *_: (0, 0, 0)),   # wlin dst
            pl.BlockSpec((1, Lp), lambda l, t, *_: (0, 0)),          # blin
        ],
        out_specs=pl.BlockSpec((Q, Lp), lambda l, t, *_: (0, 0)),
        scratch_shapes=[
            pltpu.VMEM((Np, Hp), jnp.bfloat16),    # z   (per-layer lin input)
            pltpu.VMEM((3 * Np, Hp), jnp.float32), # R   (relu'd propagations)
            pltpu.VMEM((1, Hp), jnp.float32),      # current layer bias
            pltpu.VMEM((Np, Lp), jnp.float32),     # per-node proj (src half)
            pltpu.VMEM((Np, Lp), jnp.float32),     # per-node proj (dst half)
        ],
    )

    out = pl.pallas_call(
        kernel,
        grid_spec=grid_spec,
        out_shape=jax.ShapeDtypeStruct((Q, Lp), jnp.float32),
        compiler_params=pltpu.CompilerParams(
            dimension_semantics=("arbitrary", "arbitrary")),
    )(qsrc, qdst, x_p, adj, w1_p, w2s, w3s, b1_p, b2_p, b3_p, wls, wld, blin_p)

    return out[:, :L]


# ------------------------------- Glue (JAX) -------------------------------- #
def gcn_norm_dense(edge_index, edge_weight, num_nodes):
    """Dense D^-1/2 (A + I) D^-1/2 as used by DGCNConv (improved=False)."""
    E = edge_index.shape[1]
    if edge_weight is None:
        edge_weight = jnp.ones((E,), jnp.float32)
    loop = jnp.arange(num_nodes, dtype=edge_index.dtype)
    ei = jnp.concatenate([edge_index, jnp.stack([loop, loop])], axis=1)
    ew = jnp.concatenate([edge_weight, jnp.ones((num_nodes,), jnp.float32)])
    row, col = ei[0], ei[1]                     # row = source, col = target
    deg = jnp.zeros((num_nodes,), jnp.float32).at[col].add(ew)
    dis = jnp.where(deg > 0, deg ** -0.5, 0.0)
    norm = dis[row] * ew * dis[col]
    # out[col] += norm * x[row]  =>  A_hat[col, row] = norm
    return jnp.zeros((num_nodes, num_nodes), jnp.float32).at[col, row].add(norm)


def init_params(key, num_features, hidden, label_dim):
    ks = jax.random.split(key, 5)
    s = 0.1
    return {
        # nn.Linear weights are [out, in]; stored transposed as [in, out]
        "w1": jax.random.normal(ks[0], (num_features, hidden), jnp.float32) * s,
        "w2": jax.random.normal(ks[1], (3 * hidden, hidden), jnp.float32) * s,
        "w3": jax.random.normal(ks[2], (3 * hidden, hidden), jnp.float32) * s,
        "b1": jnp.zeros((1, hidden), jnp.float32),   # nn.init.zeros_
        "b2": jnp.zeros((1, hidden), jnp.float32),
        "b3": jnp.zeros((1, hidden), jnp.float32),
        "wlin": jax.random.normal(ks[3], (6 * hidden, label_dim), jnp.float32) * s,
        "blin": jax.random.normal(ks[4], (1, label_dim), jnp.float32) * s,
    }


def ref_forward(x, A, Ain, Aout, p, query_edges):
    """Pure-JAX f32 reference of the PyTorch forward pass."""
    def block(h, b):
        h1 = A @ h + b
        h2 = Ain @ h + b
        h3 = Aout @ h + b
        return jax.nn.relu(jnp.concatenate([h1, h2, h3], axis=-1))
    h = block(x @ p["w1"], p["b1"])
    h = block(h @ p["w2"], p["b2"])
    h = block(h @ p["w3"], p["b3"])
    q = jnp.concatenate([h[query_edges[:, 0]], h[query_edges[:, 1]]], axis=-1)
    logits = q @ p["wlin"] + p["blin"]
    return jax.nn.softmax(logits, axis=-1)


if __name__ == "__main__":
    key = jax.random.PRNGKey(0)
    N, F, H, L = 16, 8, 32, 4          # nodes, num_features, hidden, label_dim
    E, Q = 40, 8                       # edges, query edges

    k = jax.random.split(key, 8)
    x = jax.random.normal(k[0], (N, F), jnp.float32)
    edge_index = jax.random.randint(k[1], (2, E), 0, N)
    edge_in = jax.random.randint(k[2], (2, E), 0, N)
    edge_out = jax.random.randint(k[3], (2, E), 0, N)
    in_w = jax.random.uniform(k[4], (E,), jnp.float32, 0.5, 1.5)
    out_w = jax.random.uniform(k[5], (E,), jnp.float32, 0.5, 1.5)
    query_edges = jax.random.randint(k[6], (Q, 2), 0, N)

    params = init_params(k[7], F, H, L)

    # dense normalized adjacencies for the three DGCNConv propagations
    A = gcn_norm_dense(edge_index, None, N)
    Ain = gcn_norm_dense(edge_in, in_w, N)
    Aout = gcn_norm_dense(edge_out, out_w, N)

    out = dgcn_link_prediction(x, A, Ain, Aout, params, query_edges)
    out = jax.block_until_ready(out)

    ref = ref_forward(x, A, Ain, Aout, params, query_edges)

    assert out.shape == (Q, L)
    assert bool(jnp.all(jnp.isfinite(out)))
    # rows of a softmax sum to 1 (approx-reciprocal epilogue => loose atol)
    assert bool(jnp.allclose(jnp.sum(out, axis=1), 1.0, atol=1e-2))
    # matches the f32 reference up to bf16 matmul drift
    assert bool(jnp.allclose(out, ref, atol=3e-2, rtol=3e-2))
    print("KERNEL_OK")
</pallas_src>

<mosaic_0001>
module attributes {stable_mosaic.version = 11 : i64} {
  func.func @kernel(%arg0: i32, %arg1: i32, %arg2: memref<8xi32, #tpu.memory_space<smem>>, %arg3: memref<8xi32, #tpu.memory_space<smem>>, %arg4: memref<16x8xbf16, #tpu.memory_space<vmem>>, %arg5: memref<16x16xbf16, #tpu.memory_space<vmem>>, %arg6: memref<8x128xbf16, #tpu.memory_space<vmem>>, %arg7: memref<3x128x128xbf16, #tpu.memory_space<vmem>>, %arg8: memref<3x128x128xbf16, #tpu.memory_space<vmem>>, %arg9: memref<1x128xf32, #tpu.memory_space<vmem>>, %arg10: memref<1x128xf32, #tpu.memory_space<vmem>>, %arg11: memref<1x128xf32, #tpu.memory_space<vmem>>, %arg12: memref<3x128x128xbf16, #tpu.memory_space<vmem>>, %arg13: memref<3x128x128xbf16, #tpu.memory_space<vmem>>, %arg14: memref<1x128xf32, #tpu.memory_space<vmem>>, %arg15: memref<8x128xf32, #tpu.memory_space<vmem>>, %arg16: memref<16x128xbf16, #tpu.memory_space<vmem>>, %arg17: memref<48x128xf32, #tpu.memory_space<vmem>>, %arg18: memref<1x128xf32, #tpu.memory_space<vmem>>, %arg19: memref<16x128xf32, #tpu.memory_space<vmem>>, %arg20: memref<16x128xf32, #tpu.memory_space<vmem>>) attributes {dimension_semantics = [#tpu.dimension_semantics<arbitrary>, #tpu.dimension_semantics<arbitrary>], iteration_bounds = array<i64: 3, 3>, scalar_prefetch = 2 : i64, scratch_operands = 5 : i64, tpu.core_type = #tpu.core_type<tc>, window_params = [{pipeline_mode = #tpu.pipeline_mode<synchronous>, transform_indices = @transform_0, window_bounds = array<i64: 16, 8>}, {transform_indices = @transform_1, window_bounds = array<i64: 16, 16>}, {pipeline_mode = #tpu.pipeline_mode<synchronous>, transform_indices = @transform_2, window_bounds = array<i64: 8, 128>}, {pipeline_mode = #tpu.pipeline_mode<synchronous>, transform_indices = @transform_3, window_bounds = array<i64: 3, 128, 128>}, {pipeline_mode = #tpu.pipeline_mode<synchronous>, transform_indices = @transform_4, window_bounds = array<i64: 3, 128, 128>}, {pipeline_mode = #tpu.pipeline_mode<synchronous>, transform_indices = @transform_5, window_bounds = array<i64: 1, 128>}, {pipeline_mode = #tpu.pipeline_mode<synchronous>, transform_indices = @transform_6, window_bounds = array<i64: 1, 128>}, {pipeline_mode = #tpu.pipeline_mode<synchronous>, transform_indices = @transform_7, window_bounds = array<i64: 1, 128>}, {pipeline_mode = #tpu.pipeline_mode<synchronous>, transform_indices = @transform_8, window_bounds = array<i64: 3, 128, 128>}, {pipeline_mode = #tpu.pipeline_mode<synchronous>, transform_indices = @transform_9, window_bounds = array<i64: 3, 128, 128>}, {pipeline_mode = #tpu.pipeline_mode<synchronous>, transform_indices = @transform_10, window_bounds = array<i64: 1, 128>}, {pipeline_mode = #tpu.pipeline_mode<synchronous>, transform_indices = @transform_11, window_bounds = array<i64: 8, 128>}]} {
    %c0_i32 = arith.constant 0 : i32
    %0 = arith.cmpi eq, %arg1, %c0_i32 : i32
    %1 = arith.extui %0 : i1 to i32
    %c0_i32_0 = arith.constant 0 : i32
    %2 = arith.cmpi ne, %1, %c0_i32_0 : i32
    scf.if %2 {
      %c0_i32_10 = arith.constant 0 : i32
      %20 = arith.cmpi eq, %arg0, %c0_i32_10 : i32
      %21 = arith.extui %20 : i1 to i32
      %c0_i32_11 = arith.constant 0 : i32
      %22 = arith.cmpi ne, %21, %c0_i32_11 : i32
      scf.if %22 {
        %c0_15 = arith.constant 0 : index
        %c0_16 = arith.constant 0 : index
        %29 = vector.load %arg4[%c0_15, %c0_16] : memref<16x8xbf16, #tpu.memory_space<vmem>>, vector<16x8xbf16>
        %c0_17 = arith.constant 0 : index
        %c0_18 = arith.constant 0 : index
        %30 = vector.load %arg6[%c0_17, %c0_18] : memref<8x128xbf16, #tpu.memory_space<vmem>>, vector<8x128xbf16>
        %cst_19 = arith.constant dense<0.000000e+00> : vector<16x128xf32>
        %31 = tpu.matmul %29, %30, %cst_19 {dimension_numbers = #tpu.dot_dimension_numbers<[1], [0], [0], [1], [0, 0, 1, 1], [], []>} : vector<16x8xbf16>, vector<8x128xbf16>, vector<16x128xf32> -> vector<16x128xf32>
        %32 = arith.truncf %31 : vector<16x128xf32> to vector<16x128xbf16>
        %c0_20 = arith.constant 0 : index
        %c0_21 = arith.constant 0 : index
        %33 = vector.load %arg16[%c0_20, %c0_21] : memref<16x128xbf16, #tpu.memory_space<vmem>>, vector<16x128xbf16>
        tpu.vector_store %arg16[%c0_20, %c0_21], %32 {strides = array<i32>} : memref<16x128xbf16, #tpu.memory_space<vmem>>, vector<16x128xbf16>,
        %c0_22 = arith.constant 0 : index
        %c0_23 = arith.constant 0 : index
        %34 = vector.load %arg9[%c0_22, %c0_23] : memref<1x128xf32, #tpu.memory_space<vmem>>, vector<1x128xf32>
        %c0_24 = arith.constant 0 : index
        %c0_25 = arith.constant 0 : index
        %35 = vector.load %arg18[%c0_24, %c0_25] : memref<1x128xf32, #tpu.memory_space<vmem>>, vector<1x128xf32>
        tpu.vector_store %arg18[%c0_24, %c0_25], %34 {strides = array<i32>} : memref<1x128xf32, #tpu.memory_space<vmem>>, vector<1x128xf32>,
      } else {
      }
      %c1_i32 = arith.constant 1 : i32
      %23 = arith.cmpi eq, %arg0, %c1_i32 : i32
      %24 = arith.extui %23 : i1 to i32
      %c0_i32_12 = arith.constant 0 : i32
      %25 = arith.cmpi ne, %24, %c0_i32_12 : i32
      scf.if %25 {
        %cst_15 = arith.constant 0.000000e+00 : f32
        %29 = vector.broadcast %cst_15 : f32 to vector<16x128xf32>
        %c0_16 = arith.constant 0 : index
        %c0_17 = arith.constant 0 : index
        %30 = vector.load %arg17[%c0_16, %c0_17] : memref<48x128xf32, #tpu.memory_space<vmem>>, vector<16x128xf32>
        %31 = arith.truncf %30 : vector<16x128xf32> to vector<16x128xbf16>
        %c0_18 = arith.constant 0 : index
        %c0_19 = arith.constant 0 : index
        %c0_20 = arith.constant 0 : index
        %32 = vector.load %arg7[%c0_18, %c0_19, %c0_20] : memref<3x128x128xbf16, #tpu.memory_space<vmem>>, vector<1x128x128xbf16>
        %33 = vector.shape_cast %32 : vector<1x128x128xbf16> to vector<128x128xbf16>
        %cst_21 = arith.constant dense<0.000000e+00> : vector<16x128xf32>
        %34 = tpu.matmul %31, %33, %cst_21 {dimension_numbers = #tpu.dot_dimension_numbers<[1], [0], [0], [1], [0, 0, 1, 1], [], []>} : vector<16x128xbf16>, vector<128x128xbf16>, vector<16x128xf32> -> vector<16x128xf32>
        %35 = arith.addf %29, %34 : vector<16x128xf32>
        %c16 = arith.constant 16 : index
        %c0_22 = arith.constant 0 : index
        %36 = vector.load %arg17[%c16, %c0_22] : memref<48x128xf32, #tpu.memory_space<vmem>>, vector<16x128xf32>
        %37 = arith.truncf %36 : vector<16x128xf32> to vector<16x128xbf16>
        %c1 = arith.constant 1 : index
        %c0_23 = arith.constant 0 : index
        %c0_24 = arith.constant 0 : index
        %38 = vector.load %arg7[%c1, %c0_23, %c0_24] : memref<3x128x128xbf16, #tpu.memory_space<vmem>>, vector<1x128x128xbf16>
        %39 = vector.shape_cast %38 : vector<1x128x128xbf16> to vector<128x128xbf16>
        %cst_25 = arith.constant dense<0.000000e+00> : vector<16x128xf32>
        %40 = tpu.matmul %37, %39, %cst_25 {dimension_numbers = #tpu.dot_dimension_numbers<[1], [0], [0], [1], [0, 0, 1, 1], [], []>} : vector<16x128xbf16>, vector<128x128xbf16>, vector<16x128xf32> -> vector<16x128xf32>
        %41 = arith.addf %35, %40 : vector<16x128xf32>
        %c32 = arith.constant 32 : index
        %c0_26 = arith.constant 0 : index
        %42 = vector.load %arg17[%c32, %c0_26] : memref<48x128xf32, #tpu.memory_space<vmem>>, vector<16x128xf32>
        %43 = arith.truncf %42 : vector<16x128xf32> to vector<16x128xbf16>
        %c2 = arith.constant 2 : index
        %c0_27 = arith.constant 0 : index
        %c0_28 = arith.constant 0 : index
        %44 = vector.load %arg7[%c2, %c0_27, %c0_28] : memref<3x128x128xbf16, #tpu.memory_space<vmem>>, vector<1x128x128xbf16>
        %45 = vector.shape_cast %44 : vector<1x128x128xbf16> to vector<128x128xbf16>
        %cst_29 = arith.constant dense<0.000000e+00> : vector<16x128xf32>
        %46 = tpu.matmul %43, %45, %cst_29 {dimension_numbers = #tpu.dot_dimension_numbers<[1], [0], [0], [1], [0, 0, 1, 1], [], []>} : vector<16x128xbf16>, vector<128x128xbf16>, vector<16x128xf32> -> vector<16x128xf32>
        %47 = arith.addf %41, %46 : vector<16x128xf32>
        %48 = arith.truncf %47 : vector<16x128xf32> to vector<16x128xbf16>
        %c0_30 = arith.constant 0 : index
        %c0_31 = arith.constant 0 : index
        %49 = vector.load %arg16[%c0_30, %c0_31] : memref<16x128xbf16, #tpu.memory_space<vmem>>, vector<16x128xbf16>
        tpu.vector_store %arg16[%c0_30, %c0_31], %48 {strides = array<i32>} : memref<16x128xbf16, #tpu.memory_space<vmem>>, vector<16x128xbf16>,
        %c0_32 = arith.constant 0 : index
        %c0_33 = arith.constant 0 : index
        %50 = vector.load %arg10[%c0_32, %c0_33] : memref<1x128xf32, #tpu.memory_space<vmem>>, vector<1x128xf32>
        %c0_34 = arith.constant 0 : index
        %c0_35 = arith.constant 0 : index
        %51 = vector.load %arg18[%c0_34, %c0_35] : memref<1x128xf32, #tpu.memory_space<vmem>>, vector<1x128xf32>
        tpu.vector_store %arg18[%c0_34, %c0_35], %50 {strides = array<i32>} : memref<1x128xf32, #tpu.memory_space<vmem>>, vector<1x128xf32>,
      } else {
      }
      %c2_i32_13 = arith.constant 2 : i32
      %26 = arith.cmpi eq, %arg0, %c2_i32_13 : i32
      %27 = arith.extui %26 : i1 to i32
      %c0_i32_14 = arith.constant 0 : i32
      %28 = arith.cmpi ne, %27, %c0_i32_14 : i32
      scf.if %28 {
        %cst_15 = arith.constant 0.000000e+00 : f32
        %29 = vector.broadcast %cst_15 : f32 to vector<16x128xf32>
        %c0_16 = arith.constant 0 : index
        %c0_17 = arith.constant 0 : index
        %30 = vector.load %arg17[%c0_16, %c0_17] : memref<48x128xf32, #tpu.memory_space<vmem>>, vector<16x128xf32>
        %31 = arith.truncf %30 : vector<16x128xf32> to vector<16x128xbf16>
        %c0_18 = arith.constant 0 : index
        %c0_19 = arith.constant 0 : index
        %c0_20 = arith.constant 0 : index
        %32 = vector.load %arg8[%c0_18, %c0_19, %c0_20] : memref<3x128x128xbf16, #tpu.memory_space<vmem>>, vector<1x128x128xbf16>
        %33 = vector.shape_cast %32 : vector<1x128x128xbf16> to vector<128x128xbf16>
        %cst_21 = arith.constant dense<0.000000e+00> : vector<16x128xf32>
        %34 = tpu.matmul %31, %33, %cst_21 {dimension_numbers = #tpu.dot_dimension_numbers<[1], [0], [0], [1], [0, 0, 1, 1], [], []>} : vector<16x128xbf16>, vector<128x128xbf16>, vector<16x128xf32> -> vector<16x128xf32>
        %35 = arith.addf %29, %34 : vector<16x128xf32>
        %c16 = arith.constant 16 : index
        %c0_22 = arith.constant 0 : index
        %36 = vector.load %arg17[%c16, %c0_22] : memref<48x128xf32, #tpu.memory_space<vmem>>, vector<16x128xf32>
        %37 = arith.truncf %36 : vector<16x128xf32> to vector<16x128xbf16>
        %c1 = arith.constant 1 : index
        %c0_23 = arith.constant 0 : index
        %c0_24 = arith.constant 0 : index
        %38 = vector.load %arg8[%c1, %c0_23, %c0_24] : memref<3x128x128xbf16, #tpu.memory_space<vmem>>, vector<1x128x128xbf16>
        %39 = vector.shape_cast %38 : vector<1x128x128xbf16> to vector<128x128xbf16>
        %cst_25 = arith.constant dense<0.000000e+00> : vector<16x128xf32>
        %40 = tpu.matmul %37, %39, %cst_25 {dimension_numbers = #tpu.dot_dimension_numbers<[1], [0], [0], [1], [0, 0, 1, 1], [], []>} : vector<16x128xbf16>, vector<128x128xbf16>, vector<16x128xf32> -> vector<16x128xf32>
        %41 = arith.addf %35, %40 : vector<16x128xf32>
        %c32 = arith.constant 32 : index
        %c0_26 = arith.constant 0 : index
        %42 = vector.load %arg17[%c32, %c0_26] : memref<48x128xf32, #tpu.memory_space<vmem>>, vector<16x128xf32>
        %43 = arith.truncf %42 : vector<16x128xf32> to vector<16x128xbf16>
        %c2 = arith.constant 2 : index
        %c0_27 = arith.constant 0 : index
        %c0_28 = arith.constant 0 : index
        %44 = vector.load %arg8[%c2, %c0_27, %c0_28] : memref<3x128x128xbf16, #tpu.memory_space<vmem>>, vector<1x128x128xbf16>
        %45 = vector.shape_cast %44 : vector<1x128x128xbf16> to vector<128x128xbf16>
        %cst_29 = arith.constant dense<0.000000e+00> : vector<16x128xf32>
        %46 = tpu.matmul %43, %45, %cst_29 {dimension_numbers = #tpu.dot_dimension_numbers<[1], [0], [0], [1], [0, 0, 1, 1], [], []>} : vector<16x128xbf16>, vector<128x128xbf16>, vector<16x128xf32> -> vector<16x128xf32>
        %47 = arith.addf %41, %46 : vector<16x128xf32>
        %48 = arith.truncf %47 : vector<16x128xf32> to vector<16x128xbf16>
        %c0_30 = arith.constant 0 : index
        %c0_31 = arith.constant 0 : index
        %49 = vector.load %arg16[%c0_30, %c0_31] : memref<16x128xbf16, #tpu.memory_space<vmem>>, vector<16x128xbf16>
        tpu.vector_store %arg16[%c0_30, %c0_31], %48 {strides = array<i32>} : memref<16x128xbf16, #tpu.memory_space<vmem>>, vector<16x128xbf16>,
        %c0_32 = arith.constant 0 : index
        %c0_33 = arith.constant 0 : index
        %50 = vector.load %arg11[%c0_32, %c0_33] : memref<1x128xf32, #tpu.memory_space<vmem>>, vector<1x128xf32>
        %c0_34 = arith.constant 0 : index
        %c0_35 = arith.constant 0 : index
        %51 = vector.load %arg18[%c0_34, %c0_35] : memref<1x128xf32, #tpu.memory_space<vmem>>, vector<1x128xf32>
        tpu.vector_store %arg18[%c0_34, %c0_35], %50 {strides = array<i32>} : memref<1x128xf32, #tpu.memory_space<vmem>>, vector<1x128xf32>,
      } else {
      }
    } else {
    }
    %c0 = arith.constant 0 : index
    %c0_1 = arith.constant 0 : index
    %3 = vector.load %arg5[%c0, %c0_1] : memref<16x16xbf16, #tpu.memory_space<vmem>>, vector<16x16xbf16>
    %c0_2 = arith.constant 0 : index
    %c0_3 = arith.constant 0 : index
    %4 = vector.load %arg16[%c0_2, %c0_3] : memref<16x128xbf16, #tpu.memory_space<vmem>>, vector<16x128xbf16>
    %cst = arith.constant dense<0.000000e+00> : vector<16x128xf32>
    %5 = tpu.matmul %3, %4, %cst {dimension_numbers = #tpu.dot_dimension_numbers<[1], [0], [0], [1], [0, 0, 1, 1], [], []>} : vector<16x16xbf16>, vector<16x128xbf16>, vector<16x128xf32> -> vector<16x128xf32>
    %c16_i32 = arith.constant 16 : i32
    %6 = arith.muli %arg1, %c16_i32 : i32
    %7 = tpu.assume_multiple %6, 16 : i32
    %c0_4 = arith.constant 0 : index
    %c0_5 = arith.constant 0 : index
    %8 = vector.load %arg18[%c0_4, %c0_5] : memref<1x128xf32, #tpu.memory_space<vmem>>, vector<1x128xf32>
    %9 = vector.broadcast %8 : vector<1x128xf32> to vector<16x128xf32>
    %10 = arith.addf %5, %9 : vector<16x128xf32>
    %cst_6 = arith.constant 0.000000e+00 : f32
    %11 = vector.broadcast %cst_6 : f32 to vector<16x128xf32>
    %12 = arith.maximumf %10, %11 : vector<16x128xf32>
    %13 = arith.index_cast %7 : i32 to index
    %c0_7 = arith.constant 0 : index
    %14 = vector.load %arg17[%13, %c0_7] : memref<48x128xf32, #tpu.memory_space<vmem>>, vector<16x128xf32>
    tpu.vector_store %arg17[%13, %c0_7], %12 {strides = array<i32>} : memref<48x128xf32, #tpu.memory_space<vmem>>, vector<16x128xf32>,
    %c2_i32 = arith.constant 2 : i32
    %15 = arith.cmpi eq, %arg0, %c2_i32 : i32
    %c2_i32_8 = arith.constant 2 : i32
    %16 = arith.cmpi eq, %arg1, %c2_i32_8 : i32
    %17 = arith.andi %15, %16 : i1
    %18 = arith.extui %17 : i1 to i32
    %c0_i32_9 = arith.constant 0 : i32
    %19 = arith.cmpi ne, %18, %c0_i32_9 : i32
    scf.if %19 {
      %cst_10 = arith.constant 0.000000e+00 : f32
      %20 = vector.broadcast %cst_10 : f32 to vector<16x128xf32>
      %cst_11 = arith.constant 0.000000e+00 : f32
      %21 = vector.broadcast %cst_11 : f32 to vector<16x128xf32>
      %c0_12 = arith.constant 0 : index
      %c0_13 = arith.constant 0 : index
      %22 = vector.load %arg17[%c0_12, %c0_13] : memref<48x128xf32, #tpu.memory_space<vmem>>, vector<16x128xf32>
      %23 = arith.truncf %22 : vector<16x128xf32> to vector<16x128xbf16>
      %c0_14 = arith.constant 0 : index
      %c0_15 = arith.constant 0 : index
      %c0_16 = arith.constant 0 : index
      %24 = vector.load %arg12[%c0_14, %c0_15, %c0_16] : memref<3x128x128xbf16, #tpu.memory_space<vmem>>, vector<1x128x128xbf16>
      %25 = vector.shape_cast %24 : vector<1x128x128xbf16> to vector<128x128xbf16>
      %cst_17 = arith.constant dense<0.000000e+00> : vector<16x128xf32>
      %26 = tpu.matmul %23, %25, %cst_17 {dimension_numbers = #tpu.dot_dimension_numbers<[1], [0], [0], [1], [0, 0, 1, 1], [], []>} : vector<16x128xbf16>, vector<128x128xbf16>, vector<16x128xf32> -> vector<16x128xf32>
      %27 = arith.addf %20, %26 : vector<16x128xf32>
      %c0_18 = arith.constant 0 : index
      %c0_19 = arith.constant 0 : index
      %c0_20 = arith.constant 0 : index
      %28 = vector.load %arg13[%c0_18, %c0_19, %c0_20] : memref<3x128x128xbf16, #tpu.memory_space<vmem>>, vector<1x128x128xbf16>
      %29 = vector.shape_cast %28 : vector<1x128x128xbf16> to vector<128x128xbf16>
      %cst_21 = arith.constant dense<0.000000e+00> : vector<16x128xf32>
      %30 = tpu.matmul %23, %29, %cst_21 {dimension_numbers = #tpu.dot_dimension_numbers<[1], [0], [0], [1], [0, 0, 1, 1], [], []>} : vector<16x128xbf16>, vector<128x128xbf16>, vector<16x128xf32> -> vector<16x128xf32>
      %31 = arith.addf %21, %30 : vector<16x128xf32>
      %c16 = arith.constant 16 : index
      %c0_22 = arith.constant 0 : index
      %32 = vector.load %arg17[%c16, %c0_22] : memref<48x128xf32, #tpu.memory_space<vmem>>, vector<16x128xf32>
      %33 = arith.truncf %32 : vector<16x128xf32> to vector<16x128xbf16>
      %c1 = arith.constant 1 : index
      %c0_23 = arith.constant 0 : index
      %c0_24 = arith.constant 0 : index
      %34 = vector.load %arg12[%c1, %c0_23, %c0_24] : memref<3x128x128xbf16, #tpu.memory_space<vmem>>, vector<1x128x128xbf16>
      %35 = vector.shape_cast %34 : vector<1x128x128xbf16> to vector<128x128xbf16>
      %cst_25 = arith.constant dense<0.000000e+00> : vector<16x128xf32>
      %36 = tpu.matmul %33, %35, %cst_25 {dimension_numbers = #tpu.dot_dimension_numbers<[1], [0], [0], [1], [0, 0, 1, 1], [], []>} : vector<16x128xbf16>, vector<128x128xbf16>, vector<16x128xf32> -> vector<16x128xf32>
      %37 = arith.addf %27, %36 : vector<16x128xf32>
      %c1_26 = arith.constant 1 : index
      %c0_27 = arith.constant 0 : index
      %c0_28 = arith.constant 0 : index
      %38 = vector.load %arg13[%c1_26, %c0_27, %c0_28] : memref<3x128x128xbf16, #tpu.memory_space<vmem>>, vector<1x128x128xbf16>
      %39 = vector.shape_cast %38 : vector<1x128x128xbf16> to vector<128x128xbf16>
      %cst_29 = arith.constant dense<0.000000e+00> : vector<16x128xf32>
      %40 = tpu.matmul %33, %39, %cst_29 {dimension_numbers = #tpu.dot_dimension_numbers<[1], [0], [0], [1], [0, 0, 1, 1], [], []>} : vector<16x128xbf16>, vector<128x128xbf16>, vector<16x128xf32> -> vector<16x128xf32>
      %41 = arith.addf %31, %40 : vector<16x128xf32>
      %c32 = arith.constant 32 : index
      %c0_30 = arith.constant 0 : index
      %42 = vector.load %arg17[%c32, %c0_30] : memref<48x128xf32, #tpu.memory_space<vmem>>, vector<16x128xf32>
      %43 = arith.truncf %42 : vector<16x128xf32> to vector<16x128xbf16>
      %c2 = arith.constant 2 : index
      %c0_31 = arith.constant 0 : index
      %c0_32 = arith.constant 0 : index
      %44 = vector.load %arg12[%c2, %c0_31, %c0_32] : memref<3x128x128xbf16, #tpu.memory_space<vmem>>, vector<1x128x128xbf16>
      %45 = vector.shape_cast %44 : vector<1x128x128xbf16> to vector<128x128xbf16>
      %cst_33 = arith.constant dense<0.000000e+00> : vector<16x128xf32>
      %46 = tpu.matmul %43, %45, %cst_33 {dimension_numbers = #tpu.dot_dimension_numbers<[1], [0], [0], [1], [0, 0, 1, 1], [], []>} : vector<16x128xbf16>, vector<128x128xbf16>, vector<16x128xf32> -> vector<16x128xf32>
      %47 = arith.addf %37, %46 : vector<16x128xf32>
      %c2_34 = arith.constant 2 : index
      %c0_35 = arith.constant 0 : index
      %c0_36 = arith.constant 0 : index
      %48 = vector.load %arg13[%c2_34, %c0_35, %c0_36] : memref<3x128x128xbf16, #tpu.memory_space<vmem>>, vector<1x128x128xbf16>
      %49 = vector.shape_cast %48 : vector<1x128x128xbf16> to vector<128x128xbf16>
      %cst_37 = arith.constant dense<0.000000e+00> : vector<16x128xf32>
      %50 = tpu.matmul %43, %49, %cst_37 {dimension_numbers = #tpu.dot_dimension_numbers<[1], [0], [0], [1], [0, 0, 1, 1], [], []>} : vector<16x128xbf16>, vector<128x128xbf16>, vector<16x128xf32> -> vector<16x128xf32>
      %51 = arith.addf %41, %50 : vector<16x128xf32>
      %c0_38 = arith.constant 0 : index
      %c0_39 = arith.constant 0 : index
      %52 = vector.load %arg19[%c0_38, %c0_39] : memref<16x128xf32, #tpu.memory_space<vmem>>, vector<16x128xf32>
      tpu.vector_store %arg19[%c0_38, %c0_39], %47 {strides = array<i32>} : memref<16x128xf32, #tpu.memory_space<vmem>>, vector<16x128xf32>,
      %c0_40 = arith.constant 0 : index
      %c0_41 = arith.constant 0 : index
      %53 = vector.load %arg20[%c0_40, %c0_41] : memref<16x128xf32, #tpu.memory_space<vmem>>, vector<16x128xf32>
      tpu.vector_store %arg20[%c0_40, %c0_41], %51 {strides = array<i32>} : memref<16x128xf32, #tpu.memory_space<vmem>>, vector<16x128xf32>,
      %c0_42 = arith.constant 0 : index
      %54 = memref.load %arg2[%c0_42] : memref<8xi32, #tpu.memory_space<smem>>
      %c0_43 = arith.constant 0 : index
      %55 = memref.load %arg3[%c0_43] : memref<8xi32, #tpu.memory_space<smem>>
      %56 = arith.index_cast %54 : i32 to index
      %c0_44 = arith.constant 0 : index
      %57 = vector.load %arg19[%56, %c0_44] : memref<16x128xf32, #tpu.memory_space<vmem>>, vector<1x128xf32>
      %58 = arith.index_cast %55 : i32 to index
      %c0_45 = arith.constant 0 : index
      %59 = vector.load %arg20[%58, %c0_45] : memref<16x128xf32, #tpu.memory_space<vmem>>, vector<1x128xf32>
      %60 = arith.addf %57, %59 : vector<1x128xf32>
      %c0_46 = arith.constant 0 : index
      %c0_47 = arith.constant 0 : index
      %61 = vector.load %arg15[%c0_46, %c0_47] : memref<8x128xf32, #tpu.memory_space<vmem>>, vector<1x128xf32>
      tpu.vector_store %arg15[%c0_46, %c0_47], %60 {strides = array<i32>} : memref<8x128xf32, #tpu.memory_space<vmem>>, vector<1x128xf32>,
      %c1_48 = arith.constant 1 : index
      %62 = memref.load %arg2[%c1_48] : memref<8xi32, #tpu.memory_space<smem>>
      %c1_49 = arith.constant 1 : index
      %63 = memref.load %arg3[%c1_49] : memref<8xi32, #tpu.memory_space<smem>>
      %64 = arith.index_cast %62 : i32 to index
      %c0_50 = arith.constant 0 : index
      %65 = vector.load %arg19[%64, %c0_50] : memref<16x128xf32, #tpu.memory_space<vmem>>, vector<1x128xf32>
      %66 = arith.index_cast %63 : i32 to index
      %c0_51 = arith.constant 0 : index
      %67 = vector.load %arg20[%66, %c0_51] : memref<16x128xf32, #tpu.memory_space<vmem>>, vector<1x128xf32>
      %68 = arith.addf %65, %67 : vector<1x128xf32>
      %c1_52 = arith.constant 1 : index
      %c0_53 = arith.constant 0 : index
      %69 = vector.load %arg15[%c1_52, %c0_53] : memref<8x128xf32, #tpu.memory_space<vmem>>, vector<1x128xf32>
      tpu.vector_store %arg15[%c1_52, %c0_53], %68 {strides = array<i32>} : memref<8x128xf32, #tpu.memory_space<vmem>>, vector<1x128xf32>,
      %c2_54 = arith.constant 2 : index
      %70 = memref.load %arg2[%c2_54] : memref<8xi32, #tpu.memory_space<smem>>
      %c2_55 = arith.constant 2 : index
      %71 = memref.load %arg3[%c2_55] : memref<8xi32, #tpu.memory_space<smem>>
      %72 = arith.index_cast %70 : i32 to index
      %c0_56 = arith.constant 0 : index
      %73 = vector.load %arg19[%72, %c0_56] : memref<16x128xf32, #tpu.memory_space<vmem>>, vector<1x128xf32>
      %74 = arith.index_cast %71 : i32 to index
      %c0_57 = arith.constant 0 : index
      %75 = vector.load %arg20[%74, %c0_57] : memref<16x128xf32, #tpu.memory_space<vmem>>, vector<1x128xf32>
      %76 = arith.addf %73, %75 : vector<1x128xf32>
      %c2_58 = arith.constant 2 : index
      %c0_59 = arith.constant 0 : index
      %77 = vector.load %arg15[%c2_58, %c0_59] : memref<8x128xf32, #tpu.memory_space<vmem>>, vector<1x128xf32>
      tpu.vector_store %arg15[%c2_58, %c0_59], %76 {strides = array<i32>} : memref<8x128xf32, #tpu.memory_space<vmem>>, vector<1x128xf32>,
      %c3 = arith.constant 3 : index
      %78 = memref.load %arg2[%c3] : memref<8xi32, #tpu.memory_space<smem>>
      %c3_60 = arith.constant 3 : index
      %79 = memref.load %arg3[%c3_60] : memref<8xi32, #tpu.memory_space<smem>>
      %80 = arith.index_cast %78 : i32 to index
      %c0_61 = arith.constant 0 : index
      %81 = vector.load %arg19[%80, %c0_61] : memref<16x128xf32, #tpu.memory_space<vmem>>, vector<1x128xf32>
      %82 = arith.index_cast %79 : i32 to index
      %c0_62 = arith.constant 0 : index
      %83 = vector.load %arg20[%82, %c0_62] : memref<16x128xf32, #tpu.memory_space<vmem>>, vector<1x128xf32>
      %84 = arith.addf %81, %83 : vector<1x128xf32>
      %c3_63 = arith.constant 3 : index
      %c0_64 = arith.constant 0 : index
      %85 = vector.load %arg15[%c3_63, %c0_64] : memref<8x128xf32, #tpu.memory_space<vmem>>, vector<1x128xf32>
      tpu.vector_store %arg15[%c3_63, %c0_64], %84 {strides = array<i32>} : memref<8x128xf32, #tpu.memory_space<vmem>>, vector<1x128xf32>,
      %c4 = arith.constant 4 : index
      %86 = memref.load %arg2[%c4] : memref<8xi32, #tpu.memory_space<smem>>
      %c4_65 = arith.constant 4 : index
      %87 = memref.load %arg3[%c4_65] : memref<8xi32, #tpu.memory_space<smem>>
      %88 = arith.index_cast %86 : i32 to index
      %c0_66 = arith.constant 0 : index
      %89 = vector.load %arg19[%88, %c0_66] : memref<16x128xf32, #tpu.memory_space<vmem>>, vector<1x128xf32>
      %90 = arith.index_cast %87 : i32 to index
      %c0_67 = arith.constant 0 : index
      %91 = vector.load %arg20[%90, %c0_67] : memref<16x128xf32, #tpu.memory_space<vmem>>, vector<1x128xf32>
      %92 = arith.addf %89, %91 : vector<1x128xf32>
      %c4_68 = arith.constant 4 : index
      %c0_69 = arith.constant 0 : index
      %93 = vector.load %arg15[%c4_68, %c0_69] : memref<8x128xf32, #tpu.memory_space<vmem>>, vector<1x128xf32>
      tpu.vector_store %arg15[%c4_68, %c0_69], %92 {strides = array<i32>} : memref<8x128xf32, #tpu.memory_space<vmem>>, vector<1x128xf32>,
      %c5 = arith.constant 5 : index
      %94 = memref.load %arg2[%c5] : memref<8xi32, #tpu.memory_space<smem>>
      %c5_70 = arith.constant 5 : index
      %95 = memref.load %arg3[%c5_70] : memref<8xi32, #tpu.memory_space<smem>>
      %96 = arith.index_cast %94 : i32 to index
      %c0_71 = arith.constant 0 : index
      %97 = vector.load %arg19[%96, %c0_71] : memref<16x128xf32, #tpu.memory_space<vmem>>, vector<1x128xf32>
      %98 = arith.index_cast %95 : i32 to index
      %c0_72 = arith.constant 0 : index
      %99 = vector.load %arg20[%98, %c0_72] : memref<16x128xf32, #tpu.memory_space<vmem>>, vector<1x128xf32>
      %100 = arith.addf %97, %99 : vector<1x128xf32>
      %c5_73 = arith.constant 5 : index
      %c0_74 = arith.constant 0 : index
      %101 = vector.load %arg15[%c5_73, %c0_74] : memref<8x128xf32, #tpu.memory_space<vmem>>, vector<1x128xf32>
      tpu.vector_store %arg15[%c5_73, %c0_74], %100 {strides = array<i32>} : memref<8x128xf32, #tpu.memory_space<vmem>>, vector<1x128xf32>,
      %c6 = arith.constant 6 : index
      %102 = memref.load %arg2[%c6] : memref<8xi32, #tpu.memory_space<smem>>
      %c6_75 = arith.constant 6 : index
      %103 = memref.load %arg3[%c6_75] : memref<8xi32, #tpu.memory_space<smem>>
      %104 = arith.index_cast %102 : i32 to index
      %c0_76 = arith.constant 0 : index
      %105 = vector.load %arg19[%104, %c0_76] : memref<16x128xf32, #tpu.memory_space<vmem>>, vector<1x128xf32>
      %106 = arith.index_cast %103 : i32 to index
      %c0_77 = arith.constant 0 : index
      %107 = vector.load %arg20[%106, %c0_77] : memref<16x128xf32, #tpu.memory_space<vmem>>, vector<1x128xf32>
      %108 = arith.addf %105, %107 : vector<1x128xf32>
      %c6_78 = arith.constant 6 : index
      %c0_79 = arith.constant 0 : index
      %109 = vector.load %arg15[%c6_78, %c0_79] : memref<8x128xf32, #tpu.memory_space<vmem>>, vector<1x128xf32>
      tpu.vector_store %arg15[%c6_78, %c0_79], %108 {strides = array<i32>} : memref<8x128xf32, #tpu.memory_space<vmem>>, vector<1x128xf32>,
      %c7 = arith.constant 7 : index
      %110 = memref.load %arg2[%c7] : memref<8xi32, #tpu.memory_space<smem>>
      %c7_80 = arith.constant 7 : index
      %111 = memref.load %arg3[%c7_80] : memref<8xi32, #tpu.memory_space<smem>>
      %112 = arith.index_cast %110 : i32 to index
      %c0_81 = arith.constant 0 : index
      %113 = vector.load %arg19[%112, %c0_81] : memref<16x128xf32, #tpu.memory_space<vmem>>, vector<1x128xf32>
      %114 = arith.index_cast %111 : i32 to index
      %c0_82 = arith.constant 0 : index
      %115 = vector.load %arg20[%114, %c0_82] : memref<16x128xf32, #tpu.memory_space<vmem>>, vector<1x128xf32>
      %116 = arith.addf %113, %115 : vector<1x128xf32>
      %c7_83 = arith.constant 7 : index
      %c0_84 = arith.constant 0 : index
      %117 = vector.load %arg15[%c7_83, %c0_84] : memref<8x128xf32, #tpu.memory_space<vmem>>, vector<1x128xf32>
      tpu.vector_store %arg15[%c7_83, %c0_84], %116 {strides = array<i32>} : memref<8x128xf32, #tpu.memory_space<vmem>>, vector<1x128xf32>,
      %c0_85 = arith.constant 0 : index
      %c0_86 = arith.constant 0 : index
      %118 = vector.load %arg15[%c0_85, %c0_86] : memref<8x128xf32, #tpu.memory_space<vmem>>, vector<8x128xf32>
      %c0_87 = arith.constant 0 : index
      %c0_88 = arith.constant 0 : index
      %119 = vector.load %arg14[%c0_87, %c0_88] : memref<1x128xf32, #tpu.memory_space<vmem>>, vector<1x128xf32>
      %120 = vector.broadcast %119 : vector<1x128xf32> to vector<8x128xf32>
      %121 = arith.addf %118, %120 : vector<8x128xf32>
      %cst_89 = arith.constant dense<0xFF800000> : vector<8xf32>
      %122 = vector.multi_reduction <maximumf>, %121, %cst_89 [1] : vector<8x128xf32> to vector<8xf32>
      %123 = vector.shape_cast %122 : vector<8xf32> to vector<8x1xf32>
      %124 = vector.broadcast %123 : vector<8x1xf32> to vector<8x128xf32>
      %125 = arith.subf %121, %124 : vector<8x128xf32>
      %126 = math.exp %125 : vector<8x128xf32>
      %cst_90 = arith.constant dense<0.000000e+00> : vector<8xf32>
      %127 = vector.multi_reduction <add>, %126, %cst_90 [1] : vector<8x128xf32> to vector<8xf32>
      %128 = vector.shape_cast %127 : vector<8xf32> to vector<8x1xf32>
      %129 = tpu.reciprocal %128 {approx = true} : vector<8x1xf32> -> vector<8x1xf32>
      %130 = vector.broadcast %129 : vector<8x1xf32> to vector<8x128xf32>
      %131 = arith.mulf %126, %130 : vector<8x128xf32>
      %c0_91 = arith.constant 0 : index
      %c0_92 = arith.constant 0 : index
      %132 = vector.load %arg15[%c0_91, %c0_92] : memref<8x128xf32, #tpu.memory_space<vmem>>, vector<8x128xf32>
      tpu.vector_store %arg15[%c0_91, %c0_92], %131 {strides = array<i32>} : memref<8x128xf32, #tpu.memory_space<vmem>>, vector<8x128xf32>,
    } else {
    }
    return
  }
  func.func @transform_0(%arg0: i32, %arg1: i32, %arg2: memref<8xi32, #tpu.memory_space<smem>>, %arg3: memref<8xi32, #tpu.memory_space<smem>>) -> (i32, i32) {
    %c0_i32 = arith.constant 0 : i32
    %c0_i32_0 = arith.constant 0 : i32
    %c0_i32_1 = arith.constant 0 : i32
    return %c0_i32, %c0_i32_0 : i32, i32
  }
  func.func @transform_1(%arg0: i32, %arg1: i32, %arg2: memref<8xi32, #tpu.memory_space<smem>>, %arg3: memref<8xi32, #tpu.memory_space<smem>>) -> (i32, i32) {
    %c0_i32 = arith.constant 0 : i32
    %c0_i32_0 = arith.constant 0 : i32
    return %arg1, %c0_i32 : i32, i32
  }
  func.func @transform_2(%arg0: i32, %arg1: i32, %arg2: memref<8xi32, #tpu.memory_space<smem>>, %arg3: memref<8xi32, #tpu.memory_space<smem>>) -> (i32, i32) {
    %c0_i32 = arith.constant 0 : i32
    %c0_i32_0 = arith.constant 0 : i32
    %c0_i32_1 = arith.constant 0 : i32
    return %c0_i32, %c0_i32_0 : i32, i32
  }
  func.func @transform_3(%arg0: i32, %arg1: i32, %arg2: memref<8xi32, #tpu.memory_space<smem>>, %arg3: memref<8xi32, #tpu.memory_space<smem>>) -> (i32, i32, i32) {
    %c0_i32 = arith.constant 0 : i32
    %c0_i32_0 = arith.constant 0 : i32
    %c0_i32_1 = arith.constant 0 : i32
    %c0_i32_2 = arith.constant 0 : i32
    return %c0_i32, %c0_i32_0, %c0_i32_1 : i32, i32, i32
  }
  func.func @transform_4(%arg0: i32, %arg1: i32, %arg2: memref<8xi32, #tpu.memory_space<smem>>, %arg3: memref<8xi32, #tpu.memory_space<smem>>) -> (i32, i32, i32) {
    %c0_i32 = arith.constant 0 : i32
    %c0_i32_0 = arith.constant 0 : i32
    %c0_i32_1 = arith.constant 0 : i32
    %c0_i32_2 = arith.constant 0 : i32
    return %c0_i32, %c0_i32_0, %c0_i32_1 : i32, i32, i32
  }
  func.func @transform_5(%arg0: i32, %arg1: i32, %arg2: memref<8xi32, #tpu.memory_space<smem>>, %arg3: memref<8xi32, #tpu.memory_space<smem>>) -> (i32, i32) {
    %c0_i32 = arith.constant 0 : i32
    %c0_i32_0 = arith.constant 0 : i32
    %c0_i32_1 = arith.constant 0 : i32
    return %c0_i32, %c0_i32_0 : i32, i32
  }
  func.func @transform_6(%arg0: i32, %arg1: i32, %arg2: memref<8xi32, #tpu.memory_space<smem>>, %arg3: memref<8xi32, #tpu.memory_space<smem>>) -> (i32, i32) {
    %c0_i32 = arith.constant 0 : i32
    %c0_i32_0 = arith.constant 0 : i32
    %c0_i32_1 = arith.constant 0 : i32
    return %c0_i32, %c0_i32_0 : i32, i32
  }
  func.func @transform_7(%arg0: i32, %arg1: i32, %arg2: memref<8xi32, #tpu.memory_space<smem>>, %arg3: memref<8xi32, #tpu.memory_space<smem>>) -> (i32, i32) {
    %c0_i32 = arith.constant 0 : i32
    %c0_i32_0 = arith.constant 0 : i32
    %c0_i32_1 = arith.constant 0 : i32
    return %c0_i32, %c0_i32_0 : i32, i32
  }
  func.func @transform_8(%arg0: i32, %arg1: i32, %arg2: memref<8xi32, #tpu.memory_space<smem>>, %arg3: memref<8xi32, #tpu.memory_space<smem>>) -> (i32, i32, i32) {
    %c0_i32 = arith.constant 0 : i32
    %c0_i32_0 = arith.constant 0 : i32
    %c0_i32_1 = arith.constant 0 : i32
    %c0_i32_2 = arith.constant 0 : i32
    return %c0_i32, %c0_i32_0, %c0_i32_1 : i32, i32, i32
  }
  func.func @transform_9(%arg0: i32, %arg1: i32, %arg2: memref<8xi32, #tpu.memory_space<smem>>, %arg3: memref<8xi32, #tpu.memory_space<smem>>) -> (i32, i32, i32) {
    %c0_i32 = arith.constant 0 : i32
    %c0_i32_0 = arith.constant 0 : i32
    %c0_i32_1 = arith.constant 0 : i32
    %c0_i32_2 = arith.constant 0 : i32
    return %c0_i32, %c0_i32_0, %c0_i32_1 : i32, i32, i32
  }
  func.func @transform_10(%arg0: i32, %arg1: i32, %arg2: memref<8xi32, #tpu.memory_space<smem>>, %arg3: memref<8xi32, #tpu.memory_space<smem>>) -> (i32, i32) {
    %c0_i32 = arith.constant 0 : i32
    %c0_i32_0 = arith.constant 0 : i32
    %c0_i32_1 = arith.constant 0 : i32
    return %c0_i32, %c0_i32_0 : i32, i32
  }
  func.func @transform_11(%arg0: i32, %arg1: i32, %arg2: memref<8xi32, #tpu.memory_space<smem>>, %arg3: memref<8xi32, #tpu.memory_space<smem>>) -> (i32, i32) {
    %c0_i32 = arith.constant 0 : i32
    %c0_i32_0 = arith.constant 0 : i32
    %c0_i32_1 = arith.constant 0 : i32
    return %c0_i32, %c0_i32_0 : i32, i32
  }
}

</mosaic_0001>

<bundles_post_ra>
// kernel: tpu_custom_call.1
= control target key start
LH: loop header
LB: loop body
LE: loop exit
PB: predicated region body
PF: predicated region fallthrough
CT: control target
= control target key end

     0   :  { %s2642_s14 = smov [#allocation8]   ;;  %s2643_s15 = smov [#allocation9]   ;;  %s2926_s0 = inlined_call_operand.vmem [shape: s32[8], index: 0, kind: input, shape index: {}]   ;;  %s2927_s2 = inlined_call_operand.vmem [shape: bf16[16,8], index: 2, kind: input, shape index: {}]   ;;  %s2928_s3 = inlined_call_operand.vmem [shape: bf16[48,16], index: 3, kind: input, shape index: {}]   ;;  %s2929_s4 = inlined_call_operand.vmem [shape: bf16[8,128], index: 4, kind: input, shape index: {}]   ;;  %s2930_s5 = inlined_call_operand.hbm [shape: bf16[3,128,128], index: 5, kind: input, shape index: {}]   ;;  %s2931_s6 = inlined_call_operand.hbm [shape: bf16[3,128,128], index: 6, kind: input, shape index: {}]   ;;  %s2932_s7 = inlined_call_operand.vmem [shape: f32[1,128], index: 7, kind: input, shape index: {}]   ;;  %s2933_s8 = inlined_call_operand.vmem [shape: f32[1,128], index: 8, kind: input, shape index: {}]   ;;  %s2934_s9 = inlined_call_operand.vmem [shape: f32[1,128], index: 9, kind: input, shape index: {}]   ;;  %s2935_s10 = inlined_call_operand.hbm [shape: bf16[3,128,128], index: 10, kind: input, shape index: {}]   ;;  %s2936_s11 = inlined_call_operand.hbm [shape: bf16[3,128,128], index: 11, kind: input, shape index: {}]   ;;  %s2937_s12 = inlined_call_operand.vmem [shape: f32[1,128], index: 12, kind: input, shape index: {}]   ;;  %s2938_s13 = inlined_call_operand.hbm [shape: f32[8,128], index: 13, kind: output, shape index: {}]   ;;  %s2939_s1 = inlined_call_operand.vmem [shape: s32[8], index: 1, kind: input, shape index: {}]  }
   0x1   :  { %2942 = sst [smem:[#allocation25_spill]] %s2927_s2  ;;  %s19_s27 = sshll.u32 %s2926_s0, 4  ;;  %s20_s27 = int_to_ptr.vmem [resolvable:$true] %s19_s27 }
   0x2   :  { %2943 = sst [smem:[#allocation26_spill]] %s2928_s3  ;;  %s24_s30 = sshll.u32 %s2939_s1, 4  ;;  %s25_s30 = int_to_ptr.vmem [resolvable:$true] %s24_s30 }
   0x3   :  { %2944 = sst [smem:[#allocation27_spill]] %s2929_s4 }
   0x4   :  { %2945 = sst [smem:[#allocation28_spill]] %s2930_s5 }
   0x5   :  { %2946 = sst [smem:[#allocation29_spill]] %s2931_s6 }
   0x6   :  { %2947 = sst [smem:[#allocation30_spill]] %s2932_s7 }
   0x7   :  { %2948 = sst [smem:[#allocation31_spill]] %s2933_s8 }
   0x8   :  { %2949 = sst [smem:[#allocation32_spill]] %s2934_s9 }
   0x9   :  { %2950 = sst [smem:[#allocation33_spill]] %s2938_s13 }
   0xa   :  { %22 = dma.vmem_to_smem %s20_s27, 16, %s2642_s14, [#allocation7] }
   0xb   :  { %27 = dma.vmem_to_smem %s25_s30, 16, %s2643_s15, [#allocation7] }
   0xc   :  { %2604 = dma.done.wait [#allocation7], 32 }
   0xd   :  { %2605 = vsyncadd [#allocation7], 4294967264 }
   0xe   :  { %30 = sfence }
   0xf   :  { %31 = vsyncpa [#allocation11], 0 }
  0x10   :  { %32 = vsyncpa [#allocation14], 0 }
  0x11   :  { %33 = vsyncpa [#allocation17], 0 }
  0x12   :  { %34 = vsyncpa [#allocation12], 0  ;;  %s2727_s16 = smov 0   ;;  %s2729_s0 = smov 0  }
  0x13   :  { %s2731_s17 = smov 0   ;;  %s2733_s1 = smov 0  }
  0x14   :  { %s2735_s18 = smov 0  }
  0x15 LB: > { %2951 = sst [smem:[#allocation24_spill]] %s2640_s18  ;;  %s2940_s19 = sadd.s32 4294967295, %s2640_s18   ;;  %s2640_s18 = sphi %s2735_s18, %s40_s18   ;;  %s2636_s1 = sphi %s2733_s1, %s2970_s1   ;;  %s2632_s17 = sphi %s2731_s17, %s2969_s17   ;;  %s2628_s0 = sphi %s2729_s0, %s2968_s0   ;;  %s2624_s16 = sphi %s2727_s16, %s2967_s16  }
  0x16   : > { %p1766_p0 = scmp.ge.s32.totalorder %s2640_s18, 1  ;;  %p314_p1 = scmp.lt.s32.totalorder %s2640_s18, 10 }
  0x17   : > { %p2757_p2 = scmp.eq.s32.totalorder %s2940_s19, 0  ;;  %s2953_s6 = sld [smem:[#allocation29_spill]] }
  0x18   : > { %p2764_p3 = pnand %p1766_p0, %p314_p1  ;;  %s2644_s25 = smov [#allocation13]  }
  0x19   : > { %s347_s26 = sshll.u32 %s2644_s25, 4  ;;  %s2645_s28 = smov 64   ;;  %s348_s26 = int_to_ptr.vmem [resolvable:$true] %s347_s26 }
  0x1a   : > { %p2334_p4 = pneg %p2764_p3  ;;  %s2646_s29 = smov 4  }
  0x1b   : > { %s49_s30 = sadd.s32 1, %s2632_s17  ;;  %s52_s14 = sadd.s32 1, %s2636_s1 }
  0x1c   : > { %p2772_p5 = pnand %p2757_p2, %p2334_p4  ;;  %p50_p6 = scmp.ge.s32.totalorder %s49_s30, 3 }
  0x1d   : > { %s345_s23 = sshll.u32 %s2953_s6, 4  ;;  %s2956_s5 = sld [smem:[#allocation28_spill]]  ;;  %s346_s23 = int_to_ptr.hbm [resolvable:$true] %s345_s23 }
  0x1e   : > { %2340 = dma.hbm_to_vmem [thread:$0]  (!%p2772_p5), %s346_s23, 3072, %s348_s26, [#allocation14], %s2645_s28, %s2645_s28, %s2646_s29  }
  0x1f   : > { %s2972_s30 = smov (%p50_p6, %s49_s30), 0  ;;  %s2974_s14 = smov (!%p50_p6, %s52_s14), %s2636_s1 }
  0x20   : > { %s2647_s25 = smov [#allocation10]   ;;  %s368_s18 = sshll.u32 %s2935_s10, 4  ;;  %s369_s18 = int_to_ptr.hbm [resolvable:$true] %s368_s18 }
  0x21   : > { %s333_s19 = sshll.u32 %s2647_s25, 4  ;;  %p54_p7 = scmp.ge.s32.totalorder %s2974_s14, 3  ;;  %s334_s19 = int_to_ptr.vmem [resolvable:$true] %s333_s19 }
  0x22   : > { %s2648_s23 = smov [#allocation15]   ;;  %s382_s25 = sshll.u32 %s2936_s11, 4  ;;  %s383_s25 = int_to_ptr.hbm [resolvable:$true] %s382_s25 }
  0x23   : > { %s331_s22 = sshll.u32 %s2956_s5, 4  ;;  %s2976_s14 = smov (%p54_p7, %s2974_s14), 0  ;;  %s332_s22 = int_to_ptr.hbm [resolvable:$true] %s331_s22 }
  0x24   : > { %2337 = dma.hbm_to_vmem [thread:$0]  (!%p2772_p5), %s332_s22, 3072, %s334_s19, [#allocation11], %s2645_s28, %s2645_s28, %s2646_s29  }
  0x25   : > { %s370_s26 = sshll.u32 %s2648_s23, 4  ;;  %s2649_s6 = smov [#allocation16]   ;;  %s371_s26 = int_to_ptr.vmem [resolvable:$true] %s370_s26 }
  0x26   : > { %2343 = dma.hbm_to_vmem [thread:$0]  (!%p2772_p5), %s369_s18, 3072, %s371_s26, [#allocation14], %s2645_s28, %s2645_s28, %s2646_s29  }
  0x27   : > { %s384_s13 = sshll.u32 %s2649_s6, 4  ;;  %412 = sbr.rel (%p2764_p3) target bundleno = 1226 (0x4ca), region = 64  ;;  %s385_s13 = int_to_ptr.vmem [resolvable:$true] %s384_s13 }
  0x28   : > { %2346 = dma.hbm_to_vmem [thread:$0]  (!%p2772_p5), %s383_s25, 3072, %s385_s13, [#allocation17], %s2645_s28, %s2645_s28, %s2646_s29  }
  0x2c   : > { %2607 = dma.done.wait (%p2757_p2), [#allocation11], 3072  }
  0x2d   : > { %2609 = vsyncadd (%p2757_p2), [#allocation11], 4294964224 }
  0x2e   : > { %2611 = dma.done.wait (%p2757_p2), [#allocation14], 6144  }
  0x2f   : > { %2613 = vsyncadd (%p2757_p2), [#allocation14], 4294961152 }
  0x30   : > { %2615 = dma.done.wait (%p2757_p2), [#allocation17], 3072  }
  0x31   : > { %2617 = vsyncadd (%p2757_p2), [#allocation17], 4294964224  ;;  %s1777_s18 = sshll.u32 %s2624_s16, 1  ;;  %s2957_s3 = sld [smem:[#allocation26_spill]] }
  0x32   : > { %p464_p8 = scmp.lt.s32.totalorder %s1777_s18, 5  ;;  %p1779_p9 = scmp.ne.s32.totalorder %s2624_s16, 0 }
  0x33   : > { %p1780_p10 = scmp.ne.s32.totalorder (!%p1779_p9), %s2628_s0, 0 }
  0x34   : > { %s2978_s18 = smov (!%p464_p8, %s1777_s18), 5  ;;  %473 = sbr.rel (%p1779_p9) target bundleno = 577 (0x241), region = 84 }
  0x35   : > { %s1778_s19 = sshll.u32 %s2978_s18, 2 }
  0x37   : > { %s2830_s28 = scalar_lea.vmem %s2957_s3, %s1778_s19 }
  0x39   : > { %477 = sbr.rel (%p1780_p10) target bundleno = 205 (0xcd), region = 88  ;;  %s2958_s4 = sld [smem:[#allocation27_spill]] (!%p1780_p10) }
  0x3a   : > { %s2959_s2 = sld [smem:[#allocation25_spill]] (!%p1780_p10) }
  0x3b   : > { %s2960_s7 = sld [smem:[#allocation30_spill]] (!%p1780_p10) }
  0x3e   : > { %vm490_vm0 = vcmask 1043456   ;;  %vm486_vm1 = vcmask 64512  }
  0x3f   : > { %v480_v0 = vld [vmem:[%s2958_s4] sm:$0xf] }
  0x40   : > { %v492_v1 = vsel %vm490_vm0, %v480_v0, 0  ;;  %v2200_v2 = vld [vmem:[%s2959_s2] sm:$0xff] }
  0x41   : > { %501 = vmatpush.bf16.msra.mxu0 %v492_v1  ;;  %v512_v3 = vld [vmem:[%s2960_s7] sm:$0x1] }
  0x42   : > { %513 = vst [vmem:[#allocation4] sm:$0x1] %v512_v3 }
  0x44   : > { %1785 = vmatmul.msk.bf16.vlgmr.msra.gmra.mxu0 %vm486_vm1, %v2200_v2 }
  0xc1   : > { %v503_v4 = vpop.f32.mrf.mxu0 }
  0xc9   : > { %v505_v5 = vpop.f32.mrf.mxu0 }
  0xca   : > { %v2302_v6 = vpack.c.bf16 %v505_v5, %v503_v4 }
  0xcc   : > { %2303 = vst [vmem:[#allocation2] sm:$0xff] %v2302_v6  }
  0xcd PF: > { %p1786_p11 = scmp.ne.s32.totalorder %s2628_s0, 1 }
  0xce   : > { %s2961_s8 = sld [smem:[#allocation31_spill]] (!%p1786_p11) }
  0xcf   : > { %517 = sbr.rel (%p1786_p11) target bundleno = 391 (0x187), region = 92 }
  0xd4   : > { %v2216_v7 = vld [vmem:[#allocation10 + $0x78] sm:$0xff]  ;;  %v2215_v10 = vld [vmem:[#allocation10 + $0x70] sm:$0xff]  ;;  %v2214_v13 = vld [vmem:[#allocation10 + $0x68] sm:$0xff] }
  0xd5   : > { %v2208_v8 = vld [vmem:[#allocation10 + $0x38] sm:$0xff]  ;;  %605 = vmatpush.bf16.msra.mxu0 %v2216_v7  ;;  %v2207_v11 = vld [vmem:[#allocation10 + $0x30] sm:$0xff]  ;;  %v2206_v14 = vld [vmem:[#allocation10 + $0x28] sm:$0xff] }
  0xd6   : > { %v2224_v9 = vld [vmem:[#allocation10 + $0xb8] sm:$0xff]  ;;  %667 = vmatpush.bf16.msra.mxu1 %v2208_v8  ;;  %v2223_v12 = vld [vmem:[#allocation10 + $0xb0] sm:$0xff]  ;;  %v2222_v15 = vld [vmem:[#allocation10 + $0xa8] sm:$0xff] }
  0xd7   : > { %749 = vmatpush.bf16.msra.mxu2 %v2224_v9  ;;  %v2213_v16 = vld [vmem:[#allocation10 + $0x60] sm:$0xff]  ;;  %v2212_v19 = vld [vmem:[#allocation10 + $0x58] sm:$0xff]  ;;  %v2211_v22 = vld [vmem:[#allocation10 + $0x50] sm:$0xff] }
  0xd8   : > { %v2205_v17 = vld [vmem:[#allocation10 + $0x20] sm:$0xff]  ;;  %v2204_v20 = vld [vmem:[#allocation10 + $0x18] sm:$0xff]  ;;  %v2203_v23 = vld [vmem:[#allocation10 + $0x10] sm:$0xff] }
  0xd9   : > { %606 = vmatpush.bf16.msra.mxu0 %v2215_v10  ;;  %v2221_v18 = vld [vmem:[#allocation10 + $0xa0] sm:$0xff]  ;;  %v2220_v21 = vld [vmem:[#allocation10 + $0x98] sm:$0xff]  ;;  %v2219_v24 = vld [vmem:[#allocation10 + $0x90] sm:$0xff] }
  0xda   : > { %668 = vmatpush.bf16.msra.mxu1 %v2207_v11  ;;  %v2210_v25 = vld [vmem:[#allocation10 + $0x48] sm:$0xff]  ;;  %v2209_v28 = vld [vmem:[#allocation10 + $0x40] sm:$0xff]  ;;  %v519_v33 = vld [vmem:[#allocation3 + $0x8] sm:$0xff] }
  0xdb   : > { %750 = vmatpush.bf16.msra.mxu2 %v2223_v12  ;;  %v2202_v26 = vld [vmem:[#allocation10 + $0x8] sm:$0xff]  ;;  %v2201_v29 = vld [vmem:[#allocation10] sm:$0xff]  ;;  %v682_v36 = vld [vmem:[#allocation3 + $0x28] sm:$0xff] }
  0xdc   : > { %v2218_v27 = vld [vmem:[#allocation10 + $0x88] sm:$0xff]  ;;  %v537_v30 = vld [vmem:[#allocation3 + $0x10] sm:$0xff]  ;;  %v769_v40 = vld [vmem:[%s2961_s8] sm:$0x1] }
  0xdd   : > { %607 = vmatpush.bf16.msra.mxu0 %v2214_v13  ;;  %v538_v31 = vld [vmem:[#allocation3 + $0x18] sm:$0xff]  ;;  %v518_v32 = vld [vmem:[#allocation3] sm:$0xff]  ;;  %770 = vst [vmem:[#allocation4] sm:$0x1] %v769_v40 }
  0xde   : > { %669 = vmatpush.bf16.msra.mxu1 %v2206_v14  ;;  %v2217_v34 = vld [vmem:[#allocation10 + $0x80] sm:$0xff]  ;;  %v681_v35 = vld [vmem:[#allocation3 + $0x20] sm:$0xff]  ;;  %v539_v37 = vpack.c.bf16 %v538_v31, %v537_v30  ;;  %v520_v38 = vpack.c.bf16 %v519_v33, %v518_v32 }
  0xdf   : > { %751 = vmatpush.bf16.msra.mxu2 %v2222_v15  ;;  %v683_v39 = vpack.c.bf16 %v682_v36, %v681_v35 }
  0xe1   : > { %608 = vmatpush.bf16.msra.mxu0 %v2213_v16 }
  0xe2   : > { %670 = vmatpush.bf16.msra.mxu1 %v2205_v17 }
  0xe3   : > { %752 = vmatpush.bf16.msra.mxu2 %v2221_v18 }
  0xe5   : > { %609 = vmatpush.bf16.msra.mxu0 %v2212_v19 }
  0xe6   : > { %671 = vmatpush.bf16.msra.mxu1 %v2204_v20 }
  0xe7   : > { %753 = vmatpush.bf16.msra.mxu2 %v2220_v21 }
  0xe9   : > { %610 = vmatpush.bf16.msra.mxu0 %v2211_v22 }
  0xea   : > { %672 = vmatpush.bf16.msra.mxu1 %v2203_v23 }
  0xeb   : > { %754 = vmatpush.bf16.msra.mxu2 %v2219_v24 }
  0xed   : > { %611 = vmatpush.bf16.msra.mxu0 %v2210_v25 }
  0xee   : > { %673 = vmatpush.bf16.msra.mxu1 %v2202_v26 }
  0xef   : > { %755 = vmatpush.bf16.msra.mxu2 %v2218_v27 }
  0xf1   : > { %612 = vmatpush.bf16.msra.mxu0 %v2209_v28 }
  0xf2   : > { %674 = vmatpush.bf16.msra.mxu1 %v2201_v29 }
  0xf3   : > { %756 = vmatpush.bf16.msra.mxu2 %v2217_v34 }
  0xf4   : > { %613 = vmatmul.bf16.vlgmr.msra.gmra.mxu0 %v539_v37 }
  0xf5   : > { %675 = vmatmul.bf16.vlgmr.msra.gmra.mxu1 %v520_v38 }
  0xf6   : > { %757 = vmatmul.bf16.vlgmr.msra.gmra.mxu2 %v683_v39 }
 0x171   : > { %v614_v41 = vpop.f32.mrf.mxu0 }
 0x172   : > { %v676_v42 = vpop.f32.mrf.mxu1 }
 0x173   : > { %v677_v46 = vadd.f32 %v676_v42, %v614_v41 }
 0x179   : > { %v758_v43 = vpop.f32.mrf.mxu2  ;;  %v616_v44 = vpop.f32.mrf.mxu0 }
 0x17a   : > { %v678_v45 = vpop.f32.mrf.mxu1  ;;  %v763_v49 = vadd.f32 %v758_v43, %v677_v46 }
 0x17b   : > { %v679_v47 = vadd.f32 %v678_v45, %v616_v44 }
 0x181   : > { %v760_v48 = vpop.f32.mrf.mxu2 }
 0x182   : > { %v764_v50 = vadd.f32 %v760_v48, %v679_v47 }
 0x184   : > { %v2307_v51 = vpack.c.bf16 %v764_v50, %v763_v49 }
 0x186   : > { %2308 = vst [vmem:[#allocation2] sm:$0xff] %v2307_v51  }
 0x187 PF: > { %p1883_p12 = scmp.ne.s32.totalorder %s2628_s0, 2 }
 0x188   : > { %s2962_s9 = sld [smem:[#allocation32_spill]] (!%p1883_p12) }
 0x189   : > { %774 = sbr.rel (%p1883_p12) target bundleno = 577 (0x241), region = 96 }
 0x18e   : > { %v2240_v52 = vld [vmem:[#allocation13 + $0x78] sm:$0xff]  ;;  %v2239_v55 = vld [vmem:[#allocation13 + $0x70] sm:$0xff]  ;;  %v2238_v58 = vld [vmem:[#allocation13 + $0x68] sm:$0xff] }
 0x18f   : > { %v2232_v53 = vld [vmem:[#allocation13 + $0x38] sm:$0xff]  ;;  %862 = vmatpush.bf16.msra.mxu0 %v2240_v52  ;;  %v2231_v56 = vld [vmem:[#allocation13 + $0x30] sm:$0xff]  ;;  %v2230_v59 = vld [vmem:[#allocation13 + $0x28] sm:$0xff] }
 0x190   : > { %v2248_v54 = vld [vmem:[#allocation13 + $0xb8] sm:$0xff]  ;;  %924 = vmatpush.bf16.msra.mxu1 %v2232_v53  ;;  %v2247_v57 = vld [vmem:[#allocation13 + $0xb0] sm:$0xff]  ;;  %v2246_v60 = vld [vmem:[#allocation13 + $0xa8] sm:$0xff] }
 0x191   : > { %1006 = vmatpush.bf16.msra.mxu2 %v2248_v54  ;;  %v2237_v61 = vld [vmem:[#allocation13 + $0x60] sm:$0xff]  ;;  %v2236_v0 = vld [vmem:[#allocation13 + $0x58] sm:$0xff]  ;;  %v2235_v3 = vld [vmem:[#allocation13 + $0x50] sm:$0xff] }
 0x192   : > { %v2229_v62 = vld [vmem:[#allocation13 + $0x20] sm:$0xff]  ;;  %v2228_v1 = vld [vmem:[#allocation13 + $0x18] sm:$0xff]  ;;  %v2227_v4 = vld [vmem:[#allocation13 + $0x10] sm:$0xff] }
 0x193   : > { %863 = vmatpush.bf16.msra.mxu0 %v2239_v55  ;;  %v2245_v63 = vld [vmem:[#allocation13 + $0xa0] sm:$0xff]  ;;  %v2244_v2 = vld [vmem:[#allocation13 + $0x98] sm:$0xff]  ;;  %v2243_v5 = vld [vmem:[#allocation13 + $0x90] sm:$0xff] }
 0x194   : > { %925 = vmatpush.bf16.msra.mxu1 %v2231_v56  ;;  %v2234_v6 = vld [vmem:[#allocation13 + $0x48] sm:$0xff]  ;;  %v2233_v9 = vld [vmem:[#allocation13 + $0x40] sm:$0xff]  ;;  %v776_v14 = vld [vmem:[#allocation3 + $0x8] sm:$0xff] }
 0x195   : > { %1007 = vmatpush.bf16.msra.mxu2 %v2247_v57  ;;  %v2226_v7 = vld [vmem:[#allocation13 + $0x8] sm:$0xff]  ;;  %v2225_v10 = vld [vmem:[#allocation13] sm:$0xff]  ;;  %v939_v17 = vld [vmem:[#allocation3 + $0x28] sm:$0xff] }
 0x196   : > { %v2242_v8 = vld [vmem:[#allocation13 + $0x88] sm:$0xff]  ;;  %v794_v11 = vld [vmem:[#allocation3 + $0x10] sm:$0xff]  ;;  %v1026_v21 = vld [vmem:[%s2962_s9] sm:$0x1] }
 0x197   : > { %864 = vmatpush.bf16.msra.mxu0 %v2238_v58  ;;  %v795_v12 = vld [vmem:[#allocation3 + $0x18] sm:$0xff]  ;;  %v775_v13 = vld [vmem:[#allocation3] sm:$0xff]  ;;  %1027 = vst [vmem:[#allocation4] sm:$0x1] %v1026_v21 }
 0x198   : > { %926 = vmatpush.bf16.msra.mxu1 %v2230_v59  ;;  %v2241_v15 = vld [vmem:[#allocation13 + $0x80] sm:$0xff]  ;;  %v938_v16 = vld [vmem:[#allocation3 + $0x20] sm:$0xff]  ;;  %v796_v18 = vpack.c.bf16 %v795_v12, %v794_v11  ;;  %v777_v19 = vpack.c.bf16 %v776_v14, %v775_v13 }
 0x199   : > { %1008 = vmatpush.bf16.msra.mxu2 %v2246_v60  ;;  %v940_v20 = vpack.c.bf16 %v939_v17, %v938_v16 }
 0x19b   : > { %865 = vmatpush.bf16.msra.mxu0 %v2237_v61 }
 0x19c   : > { %927 = vmatpush.bf16.msra.mxu1 %v2229_v62 }
 0x19d   : > { %1009 = vmatpush.bf16.msra.mxu2 %v2245_v63 }
 0x19f   : > { %866 = vmatpush.bf16.msra.mxu0 %v2236_v0 }
 0x1a0   : > { %928 = vmatpush.bf16.msra.mxu1 %v2228_v1 }
 0x1a1   : > { %1010 = vmatpush.bf16.msra.mxu2 %v2244_v2 }
 0x1a3   : > { %867 = vmatpush.bf16.msra.mxu0 %v2235_v3 }
 0x1a4   : > { %929 = vmatpush.bf16.msra.mxu1 %v2227_v4 }
 0x1a5   : > { %1011 = vmatpush.bf16.msra.mxu2 %v2243_v5 }
 0x1a7   : > { %868 = vmatpush.bf16.msra.mxu0 %v2234_v6 }
 0x1a8   : > { %930 = vmatpush.bf16.msra.mxu1 %v2226_v7 }
 0x1a9   : > { %1012 = vmatpush.bf16.msra.mxu2 %v2242_v8 }
 0x1ab   : > { %869 = vmatpush.bf16.msra.mxu0 %v2233_v9 }
 0x1ac   : > { %931 = vmatpush.bf16.msra.mxu1 %v2225_v10 }
 0x1ad   : > { %1013 = vmatpush.bf16.msra.mxu2 %v2241_v15 }
 0x1ae   : > { %870 = vmatmul.bf16.vlgmr.msra.gmra.mxu0 %v796_v18 }
 0x1af   : > { %932 = vmatmul.bf16.vlgmr.msra.gmra.mxu1 %v777_v19 }
 0x1b0   : > { %1014 = vmatmul.bf16.vlgmr.msra.gmra.mxu2 %v940_v20 }
 0x22b   : > { %v871_v22 = vpop.f32.mrf.mxu0 }
 0x22c   : > { %v933_v23 = vpop.f32.mrf.mxu1 }
 0x22d   : > { %v934_v27 = vadd.f32 %v933_v23, %v871_v22 }
 0x233   : > { %v1015_v24 = vpop.f32.mrf.mxu2  ;;  %v873_v25 = vpop.f32.mrf.mxu0 }
 0x234   : > { %v935_v26 = vpop.f32.mrf.mxu1  ;;  %v1020_v30 = vadd.f32 %v1015_v24, %v934_v27 }
 0x235   : > { %v936_v28 = vadd.f32 %v935_v26, %v873_v25 }
 0x23b   : > { %v1017_v29 = vpop.f32.mrf.mxu2 }
 0x23c   : > { %v1021_v31 = vadd.f32 %v1017_v29, %v936_v28 }
 0x23e   : > { %v2312_v32 = vpack.c.bf16 %v1021_v31, %v1020_v30 }
 0x240   : > { %2313 = vst [vmem:[#allocation2] sm:$0xff] %v2312_v32  }
 0x241 PF: > { %v2249_v34 = vld [vmem:[%s2830_s28] sm:$0xff]  ;;  %vm1048_vm2 = vcmask 130048   ;;  %p1071_p13 = scmp.eq.s32.totalorder %s2628_s0, 2  ;;  %p1072_p0 = scmp.eq.s32.totalorder %s2624_s16, 2  ;;  %v2406_v35 = vld [vmem:[#allocation4] ss:$0 sm:$0xff] }
 0x242   : > { %s1980_s18 = sshll.u32 %s2624_s16, 4 }
 0x243   : > { %p1073_p1 = pnand %p1072_p0, %p1071_p13  ;;  %s1068_s19 = scalar_lea.vmem [#allocation3], %s1980_s18 }
 0x244   : > { %s2855_s16 = sld [smem:[#allocation8]] (!%p1073_p1) }
 0x245   : > { %s2857_s0 = sld [smem:[#allocation8 + $0x1]] (!%p1073_p1) }
 0x246   : > { %s2859_s24 = sld [smem:[#allocation8 + $0x2]] (!%p1073_p1) }
 0x247   : > { %v2250_v33 = vld [vmem:[#allocation2] sm:$0xff]  ;;  %s2861_s27 = sld [smem:[#allocation8 + $0x3]] (!%p1073_p1) }
 0x248   : > { %1059 = vmatpush.bf16.msra.mxu0 %v2250_v33  ;;  %s2863_s28 = sld [smem:[#allocation8 + $0x4]] (!%p1073_p1) }
 0x249   : > { %s2865_s29 = sld [smem:[#allocation8 + $0x5]] (!%p1073_p1) }
 0x24a   : > { %s2867_s22 = sld [smem:[#allocation8 + $0x6]] (!%p1073_p1) }
 0x24b   : > { %1989 = vmatmul.msk.bf16.vlgmr.msra.gmra.mxu0 %vm1048_vm2, %v2249_v34  ;;  %s2869_s20 = sld [smem:[#allocation8 + $0x7]] (!%p1073_p1)  ;;  %s1576_s2 = scalar_lea.vmem (!%p1073_p1), [#allocation5], %s2857_s0 }
 0x24c   : > { %s2871_s23 = sld [smem:[#allocation9]] (!%p1073_p1)  ;;  %s1584_s3 = scalar_lea.vmem (!%p1073_p1), [#allocation5], %s2859_s24 }
 0x24d   : > { %s2873_s26 = sld [smem:[#allocation9 + $0x1]] (!%p1073_p1)  ;;  %s1592_s4 = scalar_lea.vmem (!%p1073_p1), [#allocation5], %s2861_s27 }
 0x24e   : > { %s2875_s15 = sld [smem:[#allocation9 + $0x2]] (!%p1073_p1)  ;;  %s1600_s5 = scalar_lea.vmem (!%p1073_p1), [#allocation5], %s2863_s28 }
 0x24f   : > { %s2877_s21 = sld [smem:[#allocation9 + $0x3]] (!%p1073_p1)  ;;  %s1608_s7 = scalar_lea.vmem (!%p1073_p1), [#allocation5], %s2865_s29 }
 0x250   : > { %s2879_s25 = sld [smem:[#allocation9 + $0x4]] (!%p1073_p1)  ;;  %s1616_s8 = scalar_lea.vmem (!%p1073_p1), [#allocation5], %s2867_s22 }
 0x251   : > { %s2881_s6 = sld [smem:[#allocation9 + $0x5]] (!%p1073_p1) }
 0x252   : > { %s2883_s13 = sld [smem:[#allocation9 + $0x6]] (!%p1073_p1)  ;;  %s1570_s9 = scalar_lea.vmem (!%p1073_p1), [#allocation6], %s2871_s23 }
 0x253   : > { %s2885_s18 = sld [smem:[#allocation9 + $0x7]] (!%p1073_p1) }
 0x2c8   : > { %v1061_v36 = vpop.f32.mrf.mxu0 }
 0x2c9   : > { %v1062_v37 = vadd.f32 %v2406_v35, %v1061_v36 }
 0x2cb   : > { %v1066_v38 = vmax.f32 %v1062_v37, 0.0 }
 0x2cd   : > { %1069 = vst [vmem:[%s1068_s19] sm:$0xff] %v1066_v38 }
 0x2d0   : > { %v1063_v39 = vpop.f32.mrf.mxu0 }
 0x2d1   : > { %v1064_v40 = vadd.f32 %v2406_v35, %v1063_v39  ;;  %1076 = sbr.rel (%p1073_p1) target bundleno = 1214 (0x4be), region = 100 }
 0x2d3   : > { %v1067_v41 = vmax.f32 %v1064_v40, 0.0 }
 0x2d5   : > { %1070 = vst [vmem:[%s1068_s19 + $0x8] sm:$0xff] %v1067_v41  ;;  %s1568_s19 = scalar_lea.vmem (!%p1073_p1), [#allocation5], %s2855_s16  ;;  %s1586_s16 = scalar_lea.vmem (!%p1073_p1), [#allocation6], %s2875_s15 }
 0x2d6   : > { %v2274_v42 = vld [vmem:[#allocation15 + $0x78] sm:$0xff]  ;;  %v2273_v44 = vld [vmem:[#allocation15 + $0x70] sm:$0xff]  ;;  %v2272_v50 = vld [vmem:[#allocation15 + $0x68] sm:$0xff] }
 0x2d7   : > { %v2258_v43 = vld [vmem:[#allocation15 + $0x38] sm:$0xff]  ;;  %1180 = vmatpush.bf16.msra.mxu0 %v2274_v42  ;;  %v2257_v45 = vld [vmem:[#allocation15 + $0x30] sm:$0xff]  ;;  %v2256_v51 = vld [vmem:[#allocation15 + $0x28] sm:$0xff] }
 0x2d8   : > { %1242 = vmatpush.bf16.msra.mxu1 %v2258_v43  ;;  %v2282_v46 = vld [vmem:[#allocation16 + $0x78] sm:$0xff]  ;;  %v2281_v48 = vld [vmem:[#allocation16 + $0x70] sm:$0xff]  ;;  %v2280_v52 = vld [vmem:[#allocation16 + $0x68] sm:$0xff] }
 0x2d9   : > { %v2266_v47 = vld [vmem:[#allocation16 + $0x38] sm:$0xff]  ;;  %1321 = vmatpush.bf16.msra.mxu2 %v2282_v46  ;;  %v2265_v49 = vld [vmem:[#allocation16 + $0x30] sm:$0xff]  ;;  %v2264_v53 = vld [vmem:[#allocation16 + $0x28] sm:$0xff] }
 0x2da   : > { %1383 = vmatpush.bf16.msra.mxu3 %v2266_v47  ;;  %v2271_v54 = vld [vmem:[#allocation15 + $0x60] sm:$0xff]  ;;  %v2270_v58 = vld [vmem:[#allocation15 + $0x58] sm:$0xff]  ;;  %v2269_v62 = vld [vmem:[#allocation15 + $0x50] sm:$0xff] }
 0x2db   : > { %1181 = vmatpush.bf16.msra.mxu0 %v2273_v44  ;;  %v2255_v55 = vld [vmem:[#allocation15 + $0x20] sm:$0xff]  ;;  %v2254_v59 = vld [vmem:[#allocation15 + $0x18] sm:$0xff]  ;;  %v2253_v63 = vld [vmem:[#allocation15 + $0x10] sm:$0xff] }
 0x2dc   : > { %1243 = vmatpush.bf16.msra.mxu1 %v2257_v45  ;;  %v2279_v56 = vld [vmem:[#allocation16 + $0x60] sm:$0xff]  ;;  %v2278_v60 = vld [vmem:[#allocation16 + $0x58] sm:$0xff]  ;;  %v2277_v0 = vld [vmem:[#allocation16 + $0x50] sm:$0xff] }
 0x2dd   : > { %1322 = vmatpush.bf16.msra.mxu2 %v2281_v48  ;;  %v2263_v57 = vld [vmem:[#allocation16 + $0x20] sm:$0xff]  ;;  %v2262_v61 = vld [vmem:[#allocation16 + $0x18] sm:$0xff]  ;;  %v2261_v1 = vld [vmem:[#allocation16 + $0x10] sm:$0xff] }
 0x2de   : > { %1384 = vmatpush.bf16.msra.mxu3 %v2265_v49  ;;  %v2268_v2 = vld [vmem:[#allocation15 + $0x48] sm:$0xff]  ;;  %v2267_v4 = vld [vmem:[#allocation15 + $0x40] sm:$0xff]  ;;  %v1078_v11 = vld [vmem:[#allocation3 + $0x8] sm:$0xff] }
 0x2df   : > { %1182 = vmatpush.bf16.msra.mxu0 %v2272_v50  ;;  %v2252_v3 = vld [vmem:[#allocation15 + $0x8] sm:$0xff]  ;;  %v2251_v6 = vld [vmem:[#allocation15] sm:$0xff]  ;;  %v2290_v12 = vld [vmem:[#allocation15 + $0xb8] sm:$0xff] }
 0x2e0   : > { %1244 = vmatpush.bf16.msra.mxu1 %v2256_v51  ;;  %v2276_v5 = vld [vmem:[#allocation16 + $0x48] sm:$0xff]  ;;  %v1112_v7 = vld [vmem:[#allocation3 + $0x10] sm:$0xff]  ;;  %v2289_v18 = vld [vmem:[#allocation15 + $0xb0] sm:$0xff] }
 0x2e1   : > { %1323 = vmatpush.bf16.msra.mxu2 %v2280_v52  ;;  %v2260_v8 = vld [vmem:[#allocation16 + $0x8] sm:$0xff]  ;;  %v2298_v13 = vld [vmem:[#allocation16 + $0xb8] sm:$0xff]  ;;  %v2275_v14 = vld [vmem:[#allocation16 + $0x40] sm:$0xff] }
 0x2e2   : > { %1385 = vmatpush.bf16.msra.mxu3 %v2264_v53  ;;  %v1113_v9 = vld [vmem:[#allocation3 + $0x18] sm:$0xff]  ;;  %v1077_v10 = vld [vmem:[#allocation3] sm:$0xff]  ;;  %v2286_v24 = vld [vmem:[#allocation15 + $0x98] sm:$0xff] }
 0x2e3   : > { %1183 = vmatpush.bf16.msra.mxu0 %v2271_v54  ;;  %v1114_v15 = vpack.c.bf16 %v1113_v9, %v1112_v7  ;;  %v1079_v16 = vpack.c.bf16 %v1078_v11, %v1077_v10  ;;  %v2259_v17 = vld [vmem:[#allocation16] sm:$0xff]  ;;  %v2297_v19 = vld [vmem:[#allocation16 + $0xb0] sm:$0xff]  ;;  %v2288_v20 = vld [vmem:[#allocation15 + $0xa8] sm:$0xff] }
 0x2e4   : > { %1245 = vmatpush.bf16.msra.mxu1 %v2255_v55  ;;  %v2296_v21 = vld [vmem:[#allocation16 + $0xa8] sm:$0xff]  ;;  %v2287_v22 = vld [vmem:[#allocation15 + $0xa0] sm:$0xff]  ;;  %v2294_v25 = vld [vmem:[#allocation16 + $0x98] sm:$0xff] }
 0x2e5   : > { %1324 = vmatpush.bf16.msra.mxu2 %v2279_v56  ;;  %v2295_v23 = vld [vmem:[#allocation16 + $0xa0] sm:$0xff]  ;;  %v2285_v26 = vld [vmem:[#allocation15 + $0x90] sm:$0xff]  ;;  %v2284_v28 = vld [vmem:[#allocation15 + $0x88] sm:$0xff] }
 0x2e6   : > { %1386 = vmatpush.bf16.msra.mxu3 %v2263_v57  ;;  %v2293_v27 = vld [vmem:[#allocation16 + $0x90] sm:$0xff]  ;;  %v2292_v29 = vld [vmem:[#allocation16 + $0x88] sm:$0xff]  ;;  %v2283_v30 = vld [vmem:[#allocation15 + $0x80] sm:$0xff] }
 0x2e7   : > { %1184 = vmatpush.bf16.msra.mxu0 %v2270_v58  ;;  %v2291_v31 = vld [vmem:[#allocation16 + $0x80] sm:$0xff]  ;;  %v1397_v32 = vld [vmem:[#allocation3 + $0x20] sm:$0xff]  ;;  %v1398_v33 = vld [vmem:[#allocation3 + $0x28] sm:$0xff] }
 0x2e8   : > { %1246 = vmatpush.bf16.msra.mxu1 %v2254_v59  ;;  %v1399_v34 = vpack.c.bf16 %v1398_v33, %v1397_v32 }
 0x2e9   : > { %1325 = vmatpush.bf16.msra.mxu2 %v2278_v60 }
 0x2ea   : > { %1387 = vmatpush.bf16.msra.mxu3 %v2262_v61 }
 0x2eb   : > { %1185 = vmatpush.bf16.msra.mxu0 %v2269_v62 }
 0x2ec   : > { %1247 = vmatpush.bf16.msra.mxu1 %v2253_v63 }
 0x2ed   : > { %1326 = vmatpush.bf16.msra.mxu2 %v2277_v0 }
 0x2ee   : > { %1388 = vmatpush.bf16.msra.mxu3 %v2261_v1 }
 0x2ef   : > { %1186 = vmatpush.bf16.msra.mxu0 %v2268_v2 }
 0x2f0   : > { %1248 = vmatpush.bf16.msra.mxu1 %v2252_v3 }
 0x2f1   : > { %1327 = vmatpush.bf16.msra.mxu2 %v2276_v5 }
 0x2f2   : > { %1389 = vmatpush.bf16.msra.mxu3 %v2260_v8 }
 0x2f3   : > { %1187 = vmatpush.bf16.msra.mxu0 %v2267_v4 }
 0x2f4   : > { %1249 = vmatpush.bf16.msra.mxu1 %v2251_v6 }
 0x2f5   : > { %1328 = vmatpush.bf16.msra.mxu2 %v2275_v14 }
 0x2f6   : > { %1188 = vmatmul.bf16.vlgmr.msra.gmra.mxu0 %v1114_v15  ;;  %1390 = vmatpush.bf16.msra.mxu3 %v2259_v17 }
 0x2f7   : > { %1465 = vmatpush.bf16.msrb.mxu0 %v2290_v12  ;;  %1250 = vmatmul.bf16.vlgmr.msra.gmra.mxu1 %v1079_v16 }
 0x2f8   : > { %1546 = vmatpush.bf16.msrb.mxu1 %v2298_v13  ;;  %1329 = vmatmul.bf16.vlgmr.msra.gmra.mxu2 %v1114_v15  ;;  %v2407_v15 = vld [vmem:[%s2937_s12] ss:$0 sm:$0xff] }
 0x2f9   : > { %1391 = vmatmul.bf16.vlgmr.msra.gmra.mxu3 %v1079_v16 }
 0x2fb   : > { %1466 = vmatpush.bf16.msrb.mxu0 %v2289_v18 }
 0x2fc   : > { %1547 = vmatpush.bf16.msrb.mxu1 %v2297_v19 }
 0x2ff   : > { %1467 = vmatpush.bf16.msrb.mxu0 %v2288_v20 }
 0x300   : > { %1548 = vmatpush.bf16.msrb.mxu1 %v2296_v21 }
 0x303   : > { %1468 = vmatpush.bf16.msrb.mxu0 %v2287_v22 }
 0x304   : > { %1549 = vmatpush.bf16.msrb.mxu1 %v2295_v23 }
 0x307   : > { %1469 = vmatpush.bf16.msrb.mxu0 %v2286_v24 }
 0x308   : > { %1550 = vmatpush.bf16.msrb.mxu1 %v2294_v25 }
 0x30b   : > { %1470 = vmatpush.bf16.msrb.mxu0 %v2285_v26 }
 0x30c   : > { %1551 = vmatpush.bf16.msrb.mxu1 %v2293_v27 }
 0x30f   : > { %1471 = vmatpush.bf16.msrb.mxu0 %v2284_v28 }
 0x310   : > { %1552 = vmatpush.bf16.msrb.mxu1 %v2292_v29 }
 0x313   : > { %1472 = vmatpush.bf16.msrb.mxu0 %v2283_v30 }
 0x314   : > { %1553 = vmatpush.bf16.msrb.mxu1 %v2291_v31 }
 0x316   : > { %1473 = vmatmul.bf16.vlgmr.msrb.gmra.mxu0 %v1399_v34 }
 0x317   : > { %1554 = vmatmul.bf16.vlgmr.msrb.gmra.mxu1 %v1399_v34 }
 0x373   : > { %v1189_v35 = vpop.f32.mrf.mxu0 }
 0x374   : > { %v1251_v36 = vpop.f32.mrf.mxu1 }
 0x375   : > { %v1252_v42 = vadd.f32 %v1251_v36, %v1189_v35 }
 0x37b   : > { %v1191_v37 = vpop.f32.mrf.mxu0  ;;  %v1330_v39 = vpop.f32.mrf.mxu2 }
 0x37c   : > { %v1253_v38 = vpop.f32.mrf.mxu1  ;;  %v1392_v40 = vpop.f32.mrf.mxu3 }
 0x37d   : > { %v1393_v41 = vadd.f32 %v1392_v40, %v1330_v39  ;;  %v1254_v49 = vadd.f32 %v1253_v38, %v1191_v37 }
 0x383   : > { %v1332_v47 = vpop.f32.mrf.mxu2 }
 0x384   : > { %v1394_v48 = vpop.f32.mrf.mxu3 }
 0x385   : > { %v1395_v50 = vadd.f32 %v1394_v48, %v1332_v47 }
 0x393   : > { %v1474_v43 = vpop.f32.mrf.mxu0 }
 0x394   : > { %v1555_v44 = vpop.f32.mrf.mxu1  ;;  %v1479_v45 = vadd.f32 %v1474_v43, %v1252_v42 }
 0x395   : > { %v1560_v46 = vadd.f32 %v1555_v44, %v1393_v41 }
 0x396   : > { %1562 = vst [vmem:[#allocation5] sm:$0xff] %v1479_v45 }
 0x397   : > { %1564 = vst [vmem:[#allocation6] sm:$0xff] %v1560_v46 }
 0x39b   : > { %v1476_v51 = vpop.f32.mrf.mxu0 }
 0x39c   : > { %v1557_v52 = vpop.f32.mrf.mxu1  ;;  %v1480_v53 = vadd.f32 %v1476_v51, %v1254_v49 }
 0x39d   : > { %v1561_v54 = vadd.f32 %v1557_v52, %v1395_v50 }
 0x39e   : > { %1563 = vst [vmem:[#allocation5 + $0x8] sm:$0xff] %v1480_v53 }
 0x39f   : > { %1565 = vst [vmem:[#allocation6 + $0x8] sm:$0xff] %v1561_v54 }
 0x3a5   : > { %v1569_v55 = vld [vmem:[%s1568_s19] sm:$0x1] }
 0x3a6   : > { %v1577_v56 = vld [vmem:[%s1576_s2] sm:$0x1]  ;;  %s1578_s2 = scalar_lea.vmem [#allocation6], %s2873_s26 }
 0x3a7   : > { %v1585_v57 = vld [vmem:[%s1584_s3] sm:$0x1]  ;;  %s1594_s3 = scalar_lea.vmem [#allocation6], %s2877_s21 }
 0x3a8   : > { %v1593_v58 = vld [vmem:[%s1592_s4] sm:$0x1]  ;;  %s1602_s4 = scalar_lea.vmem [#allocation6], %s2879_s25 }
 0x3a9   : > { %v1601_v59 = vld [vmem:[%s1600_s5] sm:$0x1]  ;;  %s1610_s5 = scalar_lea.vmem [#allocation6], %s2881_s6 }
 0x3aa   : > { %v1609_v60 = vld [vmem:[%s1608_s7] sm:$0x1]  ;;  %s1618_s7 = scalar_lea.vmem [#allocation6], %s2883_s13 }
 0x3ab   : > { %v1617_v61 = vld [vmem:[%s1616_s8] sm:$0x1]  ;;  %s1624_s8 = scalar_lea.vmem [#allocation5], %s2869_s20 }
 0x3ac   : > { %v1571_v62 = vld [vmem:[%s1570_s9] sm:$0x1]  ;;  %s1626_s9 = scalar_lea.vmem [#allocation6], %s2885_s18 }
 0x3ad   : > { %v1572_v63 = vadd.f32 %v1571_v62, %v1569_v55  ;;  %v1579_v0 = vld [vmem:[%s1578_s2] sm:$0x1] }
 0x3ae   : > { %v1587_v1 = vld [vmem:[%s1586_s16] sm:$0x1]  ;;  %v1580_v3 = vadd.f32 %v1579_v0, %v1577_v56 }
 0x3af   : > { %v1595_v2 = vld [vmem:[%s1594_s3] sm:$0x1]  ;;  %v1588_v4 = vadd.f32 %v1587_v1, %v1585_v57  ;;  %1573 = vst [vmem:[#allocation18] sm:$0x1] %v1572_v63 }
 0x3b0   : > { %v1596_v5 = vadd.f32 %v1595_v2, %v1593_v58  ;;  %v1603_v6 = vld [vmem:[%s1602_s4] sm:$0x1]  ;;  %1581 = vst [vmem:[#allocation18 + $0x1] sm:$0x1] %v1580_v3 }
 0x3b1   : > { %v1611_v7 = vld [vmem:[%s1610_s5] sm:$0x1]  ;;  %v1604_v10 = vadd.f32 %v1603_v6, %v1601_v59  ;;  %1589 = vst [vmem:[#allocation18 + $0x2] sm:$0x1] %v1588_v4 }
 0x3b2   : > { %v1619_v8 = vld [vmem:[%s1618_s7] sm:$0x1]  ;;  %v1612_v12 = vadd.f32 %v1611_v7, %v1609_v60  ;;  %1597 = vst [vmem:[#allocation18 + $0x3] sm:$0x1] %v1596_v5 }
 0x3b3   : > { %v1625_v9 = vld [vmem:[%s1624_s8] sm:$0x1]  ;;  %v1620_v13 = vadd.f32 %v1619_v8, %v1617_v61  ;;  %1605 = vst [vmem:[#allocation18 + $0x4] sm:$0x1] %v1604_v10 }
 0x3b4   : > { %v1627_v11 = vld [vmem:[%s1626_s9] sm:$0x1]  ;;  %1613 = vst [vmem:[#allocation18 + $0x5] sm:$0x1] %v1612_v12 }
 0x3b5   : > { %v1628_v14 = vadd.f32 %v1627_v11, %v1625_v9  ;;  %1621 = vst [vmem:[#allocation18 + $0x6] sm:$0x1] %v1620_v13 }
 0x3b7   : > { %1629 = vst [vmem:[#allocation18 + $0x7] sm:$0x1] %v1628_v14 }
 0x3be   : > { %v1630_v16 = vld [vmem:[#allocation18] sm:$0xff] }
 0x3bf   : > { %v1635_v17 = vadd.f32 %v2407_v15, %v1630_v16 }
 0x3c1   : > { %1636 = vmax.xlane.f32.xlu0 %v1635_v17 }
 0x434   : > { %v1637_v18 = vpop.xlane.xlu0 %1636 }
 0x435   : > { %v1638_v19 = vsub.f32 %v1635_v17, %v1637_v18 }
 0x437   : > { %v1639_v20 = vmul.f32 1.442695, %v1638_v19 }
 0x439   : > { %2408 = vpow2.f32 %v1639_v20 }
 0x43f   : > { %v2409_v21 = vpop.eup %2408 }
 0x440   : > { %1641 = vadd.xlane.f32.xlu0 %v2409_v21 }
 0x4b3   : > { %v1642_v22 = vpop.xlane.xlu0 %1641 }
 0x4b4   : > { %2410 = vrcp.f32 %v1642_v22 }
 0x4ba   : > { %v2411_v23 = vpop.eup %2410 }
 0x4bb   : > { %v1644_v24 = vmul.f32 %v2411_v23, %v2409_v21 }
 0x4bd   : > { %1645 = vst [vmem:[#allocation18] sm:$0xff] %v1644_v24 }
 0x4be PF: > { %s2963_s27 = sld [smem:[#allocation24_spill]]  ;;  %s2650_s26 = smov [#allocation18]  }
 0x4bf   : > { %s2965_s20 = sld [smem:[#allocation33_spill]]  ;;  %s1652_s15 = sshll.u32 %s2650_s26, 4  ;;  %s1653_s15 = int_to_ptr.vmem [resolvable:$true] %s1652_s15 }
 0x4c4   : > { %s2964_s28 = sadd.s32 4294967295, %s2963_s27  }
 0x4c5   : > { %p2355_p2 = scmp.eq.s32.totalorder %s2964_s28, 8  ;;  %s1654_s23 = sshll.u32 %s2965_s20, 4  ;;  %s1655_s23 = int_to_ptr.hbm [resolvable:$true] %s1654_s23 }
 0x4c7   : > { %2331 = dma.vmem_to_hbm [thread:$0]  (%p2355_p2), %s1653_s15, 128, %s1655_s23, [#allocation12]  }
 0x4c8   : > { %2619 = dma.done.wait (%p2355_p2), [#allocation12], 128  }
 0x4c9   : > { %2621 = vsyncadd (%p2355_p2), [#allocation12], 4294967168 }
 0x4ca PF: > { %s2966_s21 = sld [smem:[#allocation24_spill]]  ;;  %s2967_s16 = smov %s2632_s17 }
 0x4cb   : > { %s2968_s0 = smov %s2636_s1  ;;  %s2969_s17 = smov %s2972_s30 }
 0x4cc   : > { %s2970_s1 = smov %s2976_s14 }
 0x4d0   : > { %s40_s18 = sadd.s32 1, %s2966_s21  }
 0x4d1   : > { %p37_p3 = scmp.ge.s32.totalorder %s40_s18, 11  }
 0x4d3   :  { %39 = sbr.rel (!%p37_p3) target bundleno = 21 (0x15), region = 153 }
 0x4d8   :  { %1668 = vsyncpa [#allocation11], 1 }
 0x4d9   :  { %1670 = vsyncpa [#allocation11 + $0x1], 1 }
 0x4da   :  { %1671 = vsyncpa [#allocation14], 1 }
 0x4db   :  { %1672 = vsyncpa [#allocation17], 1 }
 0x4dc   :  { %1673 = vsyncpa [#allocation12], 1 }
 0x4dd   :  { %1675 = vsyncpa [#allocation12 + $0x1], 1 }

</bundles_post_ra>
